<compile_context>
chip_gen: v6e
topology: v6e:2x2x1
jax: 0.10.0
libtpu: 0.0.40
codegen_flags: <defaults>
</compile_context>

<pallas_src>
import jax
import jax.numpy as jnp
from jax.experimental import pallas as pl
from jax.experimental.pallas import tpu as pltpu

F_DIM = 1536           # per-input feature size (hardcoded in the module: 1536*2)
HIDDEN = 128           # opt.mlp_hidden_state


def _round_up(x, m):
    return ((x + m - 1) // m) * m


def auto_alpha_kernel(sup_ref, cen_ref, w1a_ref, w1b_ref, b1_ref, w2_ref,
                      b2_ref, out_ref):
    # fc: cat([support, center], -1) @ W1 + b1, concat fused as two matmuls.
    h = jnp.dot(sup_ref[...], w1a_ref[...], preferred_element_type=jnp.float32)
    h = h + jnp.dot(cen_ref[...], w1b_ref[...],
                    preferred_element_type=jnp.float32)
    h = h + b1_ref[...]                       # (1, H) broadcasts over batch tile
    # dropout(p=0.2) is identity at inference time.
    h = jnp.maximum(h, 0.0)                   # relu
    # fc2 + sigmoid: (TB,H)x(H,1) is a degenerate matmul -> do a lane reduction
    # on the VPU/XLU instead of occupying the MXU for one output column.
    logits = jnp.sum(h * w2_ref[...], axis=-1, keepdims=True) + b2_ref[0, 0]
    out_ref[...] = jax.nn.sigmoid(logits)


def auto_alpha(support, center, w1, b1, w2, b2, *, tb=512):
    """support, center: (B, 1536).  w1: (3072, H), b1: (H,), w2: (H, 1), b2: (1,).

    Inputs/w1 may be f32 or bf16; accumulation is f32 either way.
    tb: batch tile size (512 fits the default scoped-VMEM on every generation;
    raise it together with vmem_limit_bytes on v6e if desired).
    """
    B = support.shape[0]
    H = w1.shape[1]

    w1a = w1[:F_DIM]                               # (1536, H)
    w1b = w1[F_DIM:]                               # (1536, H)
    b1_2d = b1.reshape(1, H).astype(jnp.float32)   # (1, H), resident
    w2_row = w2.reshape(1, H).astype(jnp.float32)  # (1, H), resident
    b2_2d = b2.reshape(1, 1).astype(jnp.float32)   # (1, 1), SMEM scalar

    # Batch tile: multiple of 8 (sublane), capped by tb, covering small B.
    TB = _round_up(max(8, min(tb, _round_up(B, 8))), 8)
    B_pad = _round_up(B, TB)
    if B_pad != B:
        pad = B_pad - B
        support = jnp.pad(support, ((0, pad), (0, 0)))
        center = jnp.pad(center, ((0, pad), (0, 0)))

    grid = (B_pad // TB,)

    out = pl.pallas_call(
        auto_alpha_kernel,
        out_shape=jax.ShapeDtypeStruct((B_pad, 1), jnp.float32),
        grid=grid,
        in_specs=[
            # activations: tiled over batch, double-buffered by the pipeline
            pl.BlockSpec((TB, F_DIM), lambda i: (i, 0)),
            pl.BlockSpec((TB, F_DIM), lambda i: (i, 0)),
            # weights / biases: constant index_map -> DMA'd once, resident
            pl.BlockSpec((F_DIM, H), lambda i: (0, 0)),
            pl.BlockSpec((F_DIM, H), lambda i: (0, 0)),
            pl.BlockSpec((1, H), lambda i: (0, 0)),
            pl.BlockSpec((1, H), lambda i: (0, 0)),
            # b2: scalar in SMEM
            pl.BlockSpec(memory_space=pltpu.MemorySpace.SMEM),
        ],
        out_specs=pl.BlockSpec((TB, 1), lambda i: (i, 0)),
        compiler_params=pltpu.CompilerParams(
            dimension_semantics=("parallel",),   # megacore sharding on v7x
            vmem_limit_bytes=32 * 1024 * 1024,
        ),
    )(support, center, w1a, w1b, b1_2d, w2_row, b2_2d)

    return out[:B]


def auto_alpha_ref(support, center, w1, b1, w2, b2):
    ipt = jnp.concatenate([support.astype(jnp.float32),
                           center.astype(jnp.float32)], axis=-1)
    h = jax.nn.relu(ipt @ w1.astype(jnp.float32) + b1)
    return jax.nn.sigmoid(h @ w2 + b2)


if __name__ == "__main__":
    B = 20                                   # not a multiple of the tile -> exercises padding
    key = jax.random.PRNGKey(0)
    k_sup, k_cen, k_w1, k_b1, k_w2, k_b2 = jax.random.split(key, 6)

    support = jax.random.normal(k_sup, (B, F_DIM), dtype=jnp.float32)
    center = jax.random.normal(k_cen, (B, F_DIM), dtype=jnp.float32)

    # Deterministic parameter init (PyTorch-Linear-style uniform bounds), stored
    # pre-transposed as (in_features, out_features).
    bound1 = 1.0 / (2 * F_DIM) ** 0.5
    w1 = jax.random.uniform(k_w1, (2 * F_DIM, HIDDEN), jnp.float32, -bound1, bound1)
    b1 = jax.random.uniform(k_b1, (HIDDEN,), jnp.float32, -bound1, bound1)
    bound2 = 1.0 / HIDDEN ** 0.5
    w2 = jax.random.uniform(k_w2, (HIDDEN, 1), jnp.float32, -bound2, bound2)
    b2 = jax.random.uniform(k_b2, (1,), jnp.float32, -bound2, bound2)

    ref = auto_alpha_ref(support, center, w1, b1, w2, b2)

    # f32 path, small tile so the grid has >1 step.
    out = auto_alpha(support, center, w1, b1, w2, b2, tb=8)
    out = jax.block_until_ready(out)
    assert out.shape == (B, 1), out.shape
    assert jnp.allclose(out, ref, atol=1e-5, rtol=1e-5), (out, ref)

    # bf16 activation/weight path (halves HBM traffic; f32 accumulation kept).
    out_bf16 = auto_alpha(support.astype(jnp.bfloat16),
                          center.astype(jnp.bfloat16),
                          w1.astype(jnp.bfloat16), b1, w2, b2, tb=8)
    out_bf16 = jax.block_until_ready(out_bf16)
    assert out_bf16.shape == (B, 1), out_bf16.shape
    assert jnp.allclose(out_bf16, ref, atol=2e-2, rtol=2e-2), (out_bf16, ref)

    print("KERNEL_OK")
</pallas_src>

<mosaic_0001>
module attributes {stable_mosaic.version = 11 : i64} {
  func.func @auto_alpha_kernel(%arg0: i32, %arg1: memref<8x1536xf32, #tpu.memory_space<vmem>>, %arg2: memref<8x1536xf32, #tpu.memory_space<vmem>>, %arg3: memref<1536x128xf32, #tpu.memory_space<vmem>>, %arg4: memref<1536x128xf32, #tpu.memory_space<vmem>>, %arg5: memref<1x128xf32, #tpu.memory_space<vmem>>, %arg6: memref<1x128xf32, #tpu.memory_space<vmem>>, %arg7: memref<1x1xf32, #tpu.memory_space<smem>>, %arg8: memref<8x1xf32, #tpu.memory_space<vmem>>) attributes {dimension_semantics = [#tpu.dimension_semantics<parallel>], iteration_bounds = array<i64: 3>, scalar_prefetch = 0 : i64, scratch_operands = 0 : i64, tpu.core_type = #tpu.core_type<tc>, window_params = [{transform_indices = @transform_0, window_bounds = array<i64: 8, 1536>}, {transform_indices = @transform_1, window_bounds = array<i64: 8, 1536>}, {pipeline_mode = #tpu.pipeline_mode<synchronous>, transform_indices = @transform_2, window_bounds = array<i64: 1536, 128>}, {pipeline_mode = #tpu.pipeline_mode<synchronous>, transform_indices = @transform_3, window_bounds = array<i64: 1536, 128>}, {pipeline_mode = #tpu.pipeline_mode<synchronous>, transform_indices = @transform_4, window_bounds = array<i64: 1, 128>}, {pipeline_mode = #tpu.pipeline_mode<synchronous>, transform_indices = @transform_5, window_bounds = array<i64: 1, 128>}, {transform_indices = @transform_6, window_bounds = array<i64: 1, 1>}, {transform_indices = @transform_7, window_bounds = array<i64: 8, 1>}]} {
    %c0 = arith.constant 0 : index
    %c0_0 = arith.constant 0 : index
    %0 = vector.load %arg1[%c0, %c0_0] : memref<8x1536xf32, #tpu.memory_space<vmem>>, vector<8x1536xf32>
    %c0_1 = arith.constant 0 : index
    %c0_2 = arith.constant 0 : index
    %1 = vector.load %arg3[%c0_1, %c0_2] : memref<1536x128xf32, #tpu.memory_space<vmem>>, vector<1536x128xf32>
    %cst = arith.constant dense<0.000000e+00> : vector<8x128xf32>
    %2 = tpu.matmul %0, %1, %cst {dimension_numbers = #tpu.dot_dimension_numbers<[1], [0], [0], [1], [0, 0, 1, 1], [], []>} : vector<8x1536xf32>, vector<1536x128xf32>, vector<8x128xf32> -> vector<8x128xf32>
    %c0_3 = arith.constant 0 : index
    %c0_4 = arith.constant 0 : index
    %3 = vector.load %arg2[%c0_3, %c0_4] : memref<8x1536xf32, #tpu.memory_space<vmem>>, vector<8x1536xf32>
    %c0_5 = arith.constant 0 : index
    %c0_6 = arith.constant 0 : index
    %4 = vector.load %arg4[%c0_5, %c0_6] : memref<1536x128xf32, #tpu.memory_space<vmem>>, vector<1536x128xf32>
    %cst_7 = arith.constant dense<0.000000e+00> : vector<8x128xf32>
    %5 = tpu.matmul %3, %4, %cst_7 {dimension_numbers = #tpu.dot_dimension_numbers<[1], [0], [0], [1], [0, 0, 1, 1], [], []>} : vector<8x1536xf32>, vector<1536x128xf32>, vector<8x128xf32> -> vector<8x128xf32>
    %6 = arith.addf %2, %5 : vector<8x128xf32>
    %c0_8 = arith.constant 0 : index
    %c0_9 = arith.constant 0 : index
    %7 = vector.load %arg5[%c0_8, %c0_9] : memref<1x128xf32, #tpu.memory_space<vmem>>, vector<1x128xf32>
    %8 = vector.broadcast %7 : vector<1x128xf32> to vector<8x128xf32>
    %9 = arith.addf %6, %8 : vector<8x128xf32>
    %cst_10 = arith.constant 0.000000e+00 : f32
    %10 = vector.broadcast %cst_10 : f32 to vector<8x128xf32>
    %11 = arith.maximumf %9, %10 : vector<8x128xf32>
    %c0_11 = arith.constant 0 : index
    %c0_12 = arith.constant 0 : index
    %12 = vector.load %arg6[%c0_11, %c0_12] : memref<1x128xf32, #tpu.memory_space<vmem>>, vector<1x128xf32>
    %13 = vector.broadcast %12 : vector<1x128xf32> to vector<8x128xf32>
    %14 = arith.mulf %11, %13 : vector<8x128xf32>
    %cst_13 = arith.constant dense<0.000000e+00> : vector<8xf32>
    %15 = vector.multi_reduction <add>, %14, %cst_13 [1] : vector<8x128xf32> to vector<8xf32>
    %16 = vector.shape_cast %15 : vector<8xf32> to vector<8x1xf32>
    %c0_14 = arith.constant 0 : index
    %c0_15 = arith.constant 0 : index
    %17 = memref.load %arg7[%c0_14, %c0_15] : memref<1x1xf32, #tpu.memory_space<smem>>
    %18 = vector.broadcast %17 : f32 to vector<8x1xf32>
    %19 = arith.addf %16, %18 : vector<8x1xf32>
    %20 = arith.negf %19 : vector<8x1xf32>
    %21 = math.exp %20 : vector<8x1xf32>
    %cst_16 = arith.constant 1.000000e+00 : f32
    %22 = vector.broadcast %cst_16 : f32 to vector<8x1xf32>
    %23 = arith.addf %22, %21 : vector<8x1xf32>
    %24 = arith.divf %22, %23 : vector<8x1xf32>
    %c0_17 = arith.constant 0 : index
    %c0_18 = arith.constant 0 : index
    %25 = vector.load %arg8[%c0_17, %c0_18] : memref<8x1xf32, #tpu.memory_space<vmem>>, vector<8x1xf32>
    tpu.vector_store %arg8[%c0_17, %c0_18], %24 {strides = array<i32>} : memref<8x1xf32, #tpu.memory_space<vmem>>, vector<8x1xf32>,
    return
  }
  func.func @transform_0(%arg0: i32) -> (i32, i32) {
    %c0_i32 = arith.constant 0 : i32
    %c0_i32_0 = arith.constant 0 : i32
    return %arg0, %c0_i32 : i32, i32
  }
  func.func @transform_1(%arg0: i32) -> (i32, i32) {
    %c0_i32 = arith.constant 0 : i32
    %c0_i32_0 = arith.constant 0 : i32
    return %arg0, %c0_i32 : i32, i32
  }
  func.func @transform_2(%arg0: i32) -> (i32, i32) {
    %c0_i32 = arith.constant 0 : i32
    %c0_i32_0 = arith.constant 0 : i32
    %c0_i32_1 = arith.constant 0 : i32
    return %c0_i32, %c0_i32_0 : i32, i32
  }
  func.func @transform_3(%arg0: i32) -> (i32, i32) {
    %c0_i32 = arith.constant 0 : i32
    %c0_i32_0 = arith.constant 0 : i32
    %c0_i32_1 = arith.constant 0 : i32
    return %c0_i32, %c0_i32_0 : i32, i32
  }
  func.func @transform_4(%arg0: i32) -> (i32, i32) {
    %c0_i32 = arith.constant 0 : i32
    %c0_i32_0 = arith.constant 0 : i32
    %c0_i32_1 = arith.constant 0 : i32
    return %c0_i32, %c0_i32_0 : i32, i32
  }
  func.func @transform_5(%arg0: i32) -> (i32, i32) {
    %c0_i32 = arith.constant 0 : i32
    %c0_i32_0 = arith.constant 0 : i32
    %c0_i32_1 = arith.constant 0 : i32
    return %c0_i32, %c0_i32_0 : i32, i32
  }
  func.func @transform_6(%arg0: i32) -> (i32, i32) {
    %c0_i32 = arith.constant 0 : i32
    %c0_i32_0 = arith.constant 0 : i32
    %c0_i32_1 = arith.constant 0 : i32
    return %c0_i32, %c0_i32_0 : i32, i32
  }
  func.func @transform_7(%arg0: i32) -> (i32, i32) {
    %c0_i32 = arith.constant 0 : i32
    %c0_i32_0 = arith.constant 0 : i32
    return %arg0, %c0_i32 : i32, i32
  }
}

</mosaic_0001>

<bundles_post_ra>
// kernel: tpu_custom_call.1
= control target key start
LH: loop header
LB: loop body
LE: loop exit
PB: predicated region body
PF: predicated region fallthrough
CT: control target
= control target key end

     0   :  { %s2676_s0 = inlined_call_operand.hbm [shape: f32[24,1536], index: 0, kind: input, shape index: {}]   ;;  %s2677_s1 = inlined_call_operand.hbm [shape: f32[24,1536], index: 1, kind: input, shape index: {}]   ;;  %s2678_s2 = inlined_call_operand.hbm [shape: f32[1536,128], index: 2, kind: input, shape index: {}]   ;;  %s2679_s3 = inlined_call_operand.hbm [shape: f32[1536,128], index: 3, kind: input, shape index: {}]   ;;  %s2680_s4 = inlined_call_operand.vmem [shape: f32[1,128], index: 4, kind: input, shape index: {}]   ;;  %s2681_s5 = inlined_call_operand.vmem [shape: f32[1,128], index: 5, kind: input, shape index: {}]   ;;  %s2682_s6 = inlined_call_operand.<no memory space> [shape: f32[1,1], index: 6, kind: input, shape index: {}]   ;;  %s2683_s7 = inlined_call_operand.vmem [shape: f32[24,1], index: 7, kind: output, shape index: {}]  }
   0x1   :  { %12 = sst [smem:[#allocation2]] %s2682_s6 }
   0x2   :  { %13 = vsyncpa [#allocation4], 0 }
   0x3   :  { %15 = vsyncpa [#allocation4 + $0x1], 0 }
   0x4   :  { %16 = vsyncpa [#allocation6], 0 }
   0x5   :  { %18 = vsyncpa [#allocation6 + $0x1], 0 }
   0x6   :  { %19 = vsyncpa [#allocation9], 0  ;;  %s2465_s26 = smov 0   ;;  %s2467_s27 = smov 0  }
   0x7   :  { %s2469_s28 = smov 0   ;;  %s2471_s29 = smov 0  }
   0x8 LB: > { %s2484_s6 = sadd.s32 4294967295, %s2414_s29   ;;  %p45_p0 = scmp.ne.s32.totalorder %s2406_s27, %s2402_s26  ;;  %s2414_s29 = sphi %s2471_s29, %s2701_s29   ;;  %s2410_s28 = sphi %s2469_s28, %s2700_s28   ;;  %s2406_s27 = sphi %s2467_s27, %s2699_s27   ;;  %s2402_s26 = sphi %s2465_s26, %s2698_s26  }
   0x9   : > { %p2684_p1 = scmp.eq.s32.totalorder %s2484_s6, 0  ;;  %p1749_p2 = scmp.ge.s32.totalorder %s2414_s29, 1 }
   0xa   : > { %p213_p3 = scmp.lt.s32.totalorder %s2414_s29, 4  ;;  %s2416_s9 = smov [#allocation7]  }
   0xb   : > { %p2492_p4 = por %p2684_p1, %p45_p0  ;;  %s225_s10 = sshll.u32 %s2416_s9, 4  ;;  %s226_s10 = int_to_ptr.vmem [resolvable:$true] %s225_s10 }
   0xc   : > { %p2496_p5 = pnand %p1749_p2, %p213_p3  ;;  %s2417_s12 = smov [#allocation8]  }
   0xd   : > { %s2687_s30 = scalar_select %p2492_p4, 1, 0 }
   0xe   : > { %s2688_s8 = scalar_select %p2496_p5, 1, 0 }
   0xf   : > { %p2201_p6 = pneg %p2496_p5  ;;  %s238_s13 = sshll.u32 %s2417_s12, 4  ;;  %s239_s13 = int_to_ptr.vmem [resolvable:$true] %s238_s13 }
  0x10   : > { %s2271_s14 = scalar_lea.vmem %s226_s10, 24576  ;;  %p2279_p12 = scmp.lt.s32.totalorder %s226_s10, %s226_s10 }
  0x11   : > { %p2504_p7 = pnand %p2201_p6, %p2684_p1  ;;  %p2272_p9 = scmp.ne.s32.totalorder %s226_s10, %s2271_s14 }
  0x12   : > { %p2280_p13 = scmp.lt.s32.totalorder %s2271_s14, %s2271_s14 }
  0x13   : > { %p2262_p8 = pneg %p2504_p7 }
  0x14   : > { %p2281_p0 = por %p2280_p13, %p2279_p12 }
  0x15   : > { %p2274_p10 = pnand %p2272_p9, %p2262_p8 }
  0x17   : > { %p2275_p11 = pneg %p2274_p10 }
  0x19   : > { %p2282_p2 = pnand %p2281_p0, %p2275_p11 }
  0x1b   : > { %2285 = shalt.err (!%p2282_p2)
}
  0x1c   : > { %s2418_s15 = smov 128   ;;  %s2419_s16 = smov 8  }
  0x1d   : > { %2204 = dma.hbm_to_vmem [thread:$0]  (!%p2504_p7), %s2678_s2, 24576, %s226_s10, [#allocation6], %s2418_s15, %s2418_s15, %s2419_s16  }
  0x1e   : > { %s2297_s19 = scalar_lea.vmem %s239_s13, 24576  ;;  %p2305_p10 = scmp.lt.s32.totalorder %s239_s13, %s239_s13 }
  0x1f   : > { %p2298_p3 = scmp.ne.s32.totalorder %s239_s13, %s2297_s19  ;;  %p2306_p1 = scmp.lt.s32.totalorder %s2297_s19, %s2297_s19 }
  0x21   : > { %p2300_p6 = pnand %p2298_p3, %p2262_p8  ;;  %p2307_p12 = por %p2306_p1, %p2305_p10 }
  0x23   : > { %p2301_p9 = pneg %p2300_p6 }
  0x25   : > { %p2308_p11 = pnand %p2307_p12, %p2301_p9 }
  0x27   : > { %2311 = shalt.err (!%p2308_p11)
}
  0x28   : > { %2207 = dma.hbm_to_vmem [thread:$0]  (!%p2504_p7), %s2679_s3, 24576, %s239_s13, [#allocation9], %s2418_s15, %s2418_s15, %s2419_s16  }
  0x29   : > { %s2527_s22 = sadd.s32 1, %s2414_s29   ;;  %s32_s23 = sadd.s32 1, %s2410_s28 }
  0x2a   : > { %s29_s24 = ssub.s32 %s2414_s29, %s2527_s22  ;;  %p39_p1 = scmp.ne.s32.totalorder %s2410_s28, %s2406_s27 }
  0x2b   : > { %p30_p8 = scmp.eq.s32.totalorder %s29_s24, 0  ;;  %p40_p13 = scmp.eq.s32.totalorder %s2414_s29, 0 }
  0x2c   : > { %p2217_p0 = scmp.lt.s32.totalorder %s2414_s29, 3  ;;  %s261_s25 = sand.u32 1, %s2410_s28  }
  0x2d   : > { %s2538_s26 = scalar_select %p30_p8, %s2410_s28, %s32_s23  }
  0x2e   : > { %p41_p2 = por %p40_p13, %p39_p1  ;;  %s2540_s9 = smul.u32 96, %s261_s25 }
  0x2f   : > { %s280_s10 = sand.u32 1, %s2414_s29   ;;  %s2185_s11 = smul.u32 1536, %s2414_s29 }
  0x30   : > { %p2544_p3 = pnand %p2217_p0, %p41_p2  ;;  %s265_s16 = scalar_lea.vmem [#allocation3], %s2540_s9 }
  0x31   : > { %s2553_s15 = scalar_lea.hbm %s2676_s0, %s2185_s11  ;;  %s273_s17 = sshll.u32 %s265_s16, 4  ;;  %s274_s17 = int_to_ptr.vmem [resolvable:$true] %s273_s17 }
  0x32   : > { %s262_s18 = scalar_lea.sflag [#allocation4], %s261_s25  ;;  %s2312_s19 = scalar_lea.hbm %s2553_s15, 1536 }
  0x33   : > { %p2313_p7 = scmp.ne.s32.totalorder %s2553_s15, %s2312_s19  ;;  %p2314_p6 = pneg %p2544_p3 }
  0x34   : > { %s2317_s23 = scalar_lea.hbm %s2676_s0, 4608  ;;  %p2318_p12 = scmp.lt.s32.totalorder %s2553_s15, %s2676_s0 }
  0x35   : > { %p2315_p9 = pnand %p2314_p6, %p2313_p7  ;;  %p2319_p11 = scmp.lt.s32.totalorder %s2317_s23, %s2312_s19 }
  0x37   : > { %p2316_p10 = pneg %p2315_p9  ;;  %p2320_p1 = por %p2319_p11, %p2318_p12 }
  0x39   : > { %p2321_p8 = pnand %p2320_p1, %p2316_p10 }
  0x3b   : > { %2324 = shalt.err (!%p2321_p8)
}
  0x3c   : > { %s2325_s25 = scalar_lea.vmem %s274_s17, 1536  ;;  %s2420_s14 = smov [#allocation3]  }
  0x3d   : > { %p2326_p13 = scmp.ne.s32.totalorder %s274_s17, %s2325_s25  ;;  %s2330_s16 = sshll.u32 %s2420_s14, 4  ;;  %s2331_s16 = int_to_ptr.vmem [resolvable:$false] %s2330_s16 }
  0x3e   : > { %s2332_s20 = scalar_lea.vmem %s2331_s16, 3072  ;;  %p2333_p7 = scmp.lt.s32.totalorder %s274_s17, %s2331_s16 }
  0x3f   : > { %p2328_p0 = pnand %p2326_p13, %p2314_p6  ;;  %p2334_p9 = scmp.lt.s32.totalorder %s2332_s20, %s2325_s25 }
  0x41   : > { %p2329_p2 = pneg %p2328_p0  ;;  %p2335_p4 = por %p2334_p9, %p2333_p7 }
  0x43   : > { %p2336_p5 = pnand %p2335_p4, %p2329_p2 }
  0x45   : > { %2339 = shalt.err (!%p2336_p5)
}
  0x46   : > { %2211 = dma.hbm_to_vmem [thread:$0]  (!%p2544_p3), %s2553_s15, 1536, %s274_s17, %s262_s18  }
  0x47   : > { %s2581_s23 = scalar_lea.hbm %s2677_s1, %s2185_s11  ;;  %s284_s24 = scalar_lea.vmem [#allocation5], %s2540_s9 }
  0x48   : > { %s292_s13 = sshll.u32 %s284_s24, 4  ;;  %s281_s25 = scalar_lea.sflag [#allocation6], %s280_s10  ;;  %s293_s13 = int_to_ptr.vmem [resolvable:$true] %s292_s13 }
  0x49   : > { %s2340_s14 = scalar_lea.hbm %s2581_s23, 1536  ;;  %s2345_s18 = scalar_lea.hbm %s2677_s1, 4608 }
  0x4a   : > { %p2341_p4 = scmp.ne.s32.totalorder %s2581_s23, %s2340_s14  ;;  %p2346_p12 = scmp.lt.s32.totalorder %s2581_s23, %s2677_s1 }
  0x4b   : > { %p2347_p11 = scmp.lt.s32.totalorder %s2345_s18, %s2340_s14 }
  0x4c   : > { %p2343_p5 = pnand %p2341_p4, %p2314_p6 }
  0x4d   : > { %p2348_p1 = por %p2347_p11, %p2346_p12 }
  0x4e   : > { %p2344_p10 = pneg %p2343_p5 }
  0x50   : > { %p2349_p8 = pnand %p2348_p1, %p2344_p10 }
  0x52   : > { %2352 = shalt.err (!%p2349_p8)
}
  0x53   : > { %s2353_s29 = scalar_lea.vmem %s293_s13, 1536  ;;  %s2421_s9 = smov [#allocation5]  }
  0x54   : > { %p2354_p13 = scmp.ne.s32.totalorder %s293_s13, %s2353_s29  ;;  %s2358_s10 = sshll.u32 %s2421_s9, 4  ;;  %s2359_s10 = int_to_ptr.vmem [resolvable:$false] %s2358_s10 }
  0x55   : > { %s2360_s20 = scalar_lea.vmem %s2359_s10, 3072  ;;  %p2361_p7 = scmp.lt.s32.totalorder %s293_s13, %s2359_s10 }
  0x56   : > { %p2356_p0 = pnand %p2354_p13, %p2314_p6  ;;  %p2362_p9 = scmp.lt.s32.totalorder %s2360_s20, %s2353_s29 }
  0x58   : > { %p2357_p2 = pneg %p2356_p0  ;;  %p2363_p4 = por %p2362_p9, %p2361_p7 }
  0x5a   : > { %p2364_p5 = pnand %p2363_p4, %p2357_p2 }
  0x5c   : > { %2367 = shalt.err (!%p2364_p5)
}
  0x5d   : > { %2214 = dma.hbm_to_vmem [thread:$0]  (!%p2544_p3), %s2581_s23, 1536, %s293_s13, %s281_s25  }
  0x5e   : > { %p2691_p10 = scmp.ne.s32.totalorder %s2688_s8, 0 }
  0x5f   : > { %s303_s19 = sand.u32 (!%p2691_p10), 1, %s2406_s27   ;;  %p2692_p6 = scmp.ne.s32.totalorder (!%p2691_p10), %s2687_s30, 0 }
  0x60   : > { %301 = sbr.rel (%p2691_p10) target bundleno = 696 (0x2b8), region = 48  ;;  %s304_s24 = scalar_lea.sflag (!%p2691_p10), [#allocation4], %s303_s19 }
  0x61   : > { %s2188_s21 = smul.u32 (!%p2691_p10), 96, %s303_s19 }
  0x63   : > { %s2607_s14 = scalar_lea.vmem (!%p2691_p10), [#allocation3], %s2188_s21 }
  0x65   : > { %2385 = dma.done.wait (%p2692_p6), %s304_s24, 1536  }
  0x66   : > { %2387 = vsyncadd (%p2692_p6), %s304_s24, 4294965760  ;;  %s312_s12 = sand.u32 1, %s2484_s6   ;;  %s2614_s23 = scalar_lea.vmem [#allocation5], %s2188_s21 }
  0x67   : > { %s313_s15 = scalar_lea.sflag [#allocation6], %s312_s12 }
  0x68   : > { %2389 = dma.done.wait (%p2692_p6), %s313_s15, 1536  }
  0x69   : > { %2391 = vsyncadd (%p2692_p6), %s313_s15, 4294965760  ;;  %p2693_p3 = scmp.eq.s32.totalorder %s2484_s6, 0 }
  0x6b   : > { %2393 = dma.done.wait (%p2693_p3), [#allocation6], 24576   ;;  %p2694_p12 = pmov %p2693_p3 }
  0x6c   : > { %p2695_p11 = pmov %p2693_p3 }
  0x6d   : > { %2395 = vsyncadd (%p2694_p12), [#allocation6], 4294942720 }
  0x6e   : > { %2397 = dma.done.wait (%p2695_p11), [#allocation9], 24576   ;;  %p2696_p1 = pmov %p2693_p3 }
  0x6f   : > { %v610_v0 = vld [vmem:[#allocation8 + $0xf8] sm:$0xff]  ;;  %v609_v4 = vld [vmem:[#allocation8 + $0xf0] sm:$0xff]  ;;  %v608_v8 = vld [vmem:[#allocation8 + $0xe8] sm:$0xff]  ;;  %s1630_s17 = sld [smem:[#allocation2]]  ;;  %p359_p8 = scmp.lt.s32.totalorder %s2484_s6, 2  ;;  %vm1639_vm0 = vcmask 7168  }
  0x70   : > { %2399 = vsyncadd (%p2696_p1), [#allocation9], 4294942720  ;;  %v642_v1 = vld [vmem:[#allocation8 + $0x1f8] sm:$0xff]  ;;  %1764 = vmatprep.subr.mxu0 %v610_v0  ;;  %v641_v5 = vld [vmem:[#allocation8 + $0x1f0] sm:$0xff] }
  0x71   : > { %v594_v2 = vld [vmem:[#allocation8 + $0x78] sm:$0xff]  ;;  %1799 = vmatprep.subr.mxu1 %v642_v1  ;;  %v593_v6 = vld [vmem:[#allocation8 + $0x70] sm:$0xff]  ;;  %v640_v9 = vld [vmem:[#allocation8 + $0x1e8] sm:$0xff]  ;;  %s2703_s6 = smov (!%p359_p8, %s2484_s6), 2 }
  0x72   : > { %v626_v3 = vld [vmem:[#allocation8 + $0x178] sm:$0xff]  ;;  %1765 = vmatpush3.msra.mxu0 %v594_v2  ;;  %v625_v7 = vld [vmem:[#allocation8 + $0x170] sm:$0xff]  ;;  %v592_v10 = vld [vmem:[#allocation8 + $0x68] sm:$0xff]  ;;  %s1758_s18 = sshll.u32 %s2703_s6, 3 }
  0x73   : > { %1800 = vmatpush3.msra.mxu1 %v626_v3  ;;  %1766 = vmatprep.subr.mxu0 %v609_v4  ;;  %v624_v11 = vld [vmem:[#allocation8 + $0x168] sm:$0xff]  ;;  %v607_v12 = vld [vmem:[#allocation8 + $0xe0] sm:$0xff]  ;;  %v606_v16 = vld [vmem:[#allocation8 + $0xd8] sm:$0xff]  ;;  %s362_s29 = scalar_lea.vmem %s2683_s7, %s1758_s18 }
  0x74   : > { %1801 = vmatprep.subr.mxu1 %v641_v5  ;;  %1767 = vmatpush3.msra.mxu0 %v593_v6  ;;  %v639_v13 = vld [vmem:[#allocation8 + $0x1e0] sm:$0xff]  ;;  %v638_v17 = vld [vmem:[#allocation8 + $0x1d8] sm:$0xff]  ;;  %v605_v20 = vld [vmem:[#allocation8 + $0xd0] sm:$0xff] }
  0x75   : > { %1802 = vmatpush3.msra.mxu1 %v625_v7  ;;  %1768 = vmatprep.subr.mxu0 %v608_v8  ;;  %v591_v14 = vld [vmem:[#allocation8 + $0x60] sm:$0xff]  ;;  %v590_v18 = vld [vmem:[#allocation8 + $0x58] sm:$0xff]  ;;  %v637_v21 = vld [vmem:[#allocation8 + $0x1d0] sm:$0xff] }
  0x76   : > { %1803 = vmatprep.subr.mxu1 %v640_v9  ;;  %v623_v15 = vld [vmem:[#allocation8 + $0x160] sm:$0xff]  ;;  %1769 = vmatpush3.msra.mxu0 %v592_v10  ;;  %v622_v19 = vld [vmem:[#allocation8 + $0x158] sm:$0xff]  ;;  %v589_v22 = vld [vmem:[#allocation8 + $0x50] sm:$0xff] }
  0x77   : > { %1804 = vmatpush3.msra.mxu1 %v624_v11  ;;  %1770 = vmatprep.subr.mxu0 %v607_v12  ;;  %v621_v23 = vld [vmem:[#allocation8 + $0x150] sm:$0xff]  ;;  %v604_v24 = vld [vmem:[#allocation8 + $0xc8] sm:$0xff]  ;;  %v603_v28 = vld [vmem:[#allocation8 + $0xc0] sm:$0xff] }
  0x78   : > { %1805 = vmatprep.subr.mxu1 %v639_v13  ;;  %1771 = vmatpush3.msra.mxu0 %v591_v14  ;;  %v636_v25 = vld [vmem:[#allocation8 + $0x1c8] sm:$0xff]  ;;  %v635_v29 = vld [vmem:[#allocation8 + $0x1c0] sm:$0xff]  ;;  %v602_v32 = vld [vmem:[#allocation8 + $0xb8] sm:$0xff] }
  0x79   : > { %1806 = vmatpush3.msra.mxu1 %v623_v15  ;;  %1772 = vmatprep.subr.mxu0 %v606_v16  ;;  %v588_v26 = vld [vmem:[#allocation8 + $0x48] sm:$0xff]  ;;  %v587_v30 = vld [vmem:[#allocation8 + $0x40] sm:$0xff]  ;;  %v634_v33 = vld [vmem:[#allocation8 + $0x1b8] sm:$0xff] }
  0x7a   : > { %1807 = vmatprep.subr.mxu1 %v638_v17  ;;  %1773 = vmatpush3.msra.mxu0 %v590_v18  ;;  %v620_v27 = vld [vmem:[#allocation8 + $0x148] sm:$0xff]  ;;  %v619_v31 = vld [vmem:[#allocation8 + $0x140] sm:$0xff]  ;;  %v586_v34 = vld [vmem:[#allocation8 + $0x38] sm:$0xff] }
  0x7b   : > { %1808 = vmatpush3.msra.mxu1 %v622_v19  ;;  %1774 = vmatprep.subr.mxu0 %v605_v20  ;;  %v618_v35 = vld [vmem:[#allocation8 + $0x138] sm:$0xff]  ;;  %v601_v36 = vld [vmem:[#allocation8 + $0xb0] sm:$0xff]  ;;  %v600_v40 = vld [vmem:[#allocation8 + $0xa8] sm:$0xff] }
  0x7c   : > { %1809 = vmatprep.subr.mxu1 %v637_v21  ;;  %1775 = vmatpush3.msra.mxu0 %v589_v22  ;;  %v633_v37 = vld [vmem:[#allocation8 + $0x1b0] sm:$0xff]  ;;  %v632_v41 = vld [vmem:[#allocation8 + $0x1a8] sm:$0xff]  ;;  %v599_v44 = vld [vmem:[#allocation8 + $0xa0] sm:$0xff] }
  0x7d   : > { %1810 = vmatpush3.msra.mxu1 %v621_v23  ;;  %1776 = vmatprep.subr.mxu0 %v604_v24  ;;  %v585_v38 = vld [vmem:[#allocation8 + $0x30] sm:$0xff]  ;;  %v584_v42 = vld [vmem:[#allocation8 + $0x28] sm:$0xff]  ;;  %v631_v45 = vld [vmem:[#allocation8 + $0x1a0] sm:$0xff] }
  0x7e   : > { %1811 = vmatprep.subr.mxu1 %v636_v25  ;;  %1777 = vmatpush3.msra.mxu0 %v588_v26  ;;  %v617_v39 = vld [vmem:[#allocation8 + $0x130] sm:$0xff]  ;;  %v616_v43 = vld [vmem:[#allocation8 + $0x128] sm:$0xff]  ;;  %v583_v46 = vld [vmem:[#allocation8 + $0x20] sm:$0xff] }
  0x7f   : > { %1812 = vmatpush3.msra.mxu1 %v620_v27  ;;  %1778 = vmatprep.subr.mxu0 %v603_v28  ;;  %v615_v47 = vld [vmem:[#allocation8 + $0x120] sm:$0xff]  ;;  %v598_v48 = vld [vmem:[#allocation8 + $0x98] sm:$0xff]  ;;  %v597_v52 = vld [vmem:[#allocation8 + $0x90] sm:$0xff] }
  0x80   : > { %1813 = vmatprep.subr.mxu1 %v635_v29  ;;  %1779 = vmatpush3.msra.mxu0 %v587_v30  ;;  %v630_v49 = vld [vmem:[#allocation8 + $0x198] sm:$0xff]  ;;  %v629_v53 = vld [vmem:[#allocation8 + $0x190] sm:$0xff]  ;;  %v596_v56 = vld [vmem:[#allocation8 + $0x88] sm:$0xff] }
  0x81   : > { %1814 = vmatpush3.msra.mxu1 %v619_v31  ;;  %1780 = vmatprep.subr.mxu0 %v602_v32  ;;  %v582_v50 = vld [vmem:[#allocation8 + $0x18] sm:$0xff]  ;;  %v581_v54 = vld [vmem:[#allocation8 + $0x10] sm:$0xff]  ;;  %v628_v57 = vld [vmem:[#allocation8 + $0x188] sm:$0xff] }
  0x82   : > { %1815 = vmatprep.subr.mxu1 %v634_v33  ;;  %1781 = vmatpush3.msra.mxu0 %v586_v34  ;;  %v614_v51 = vld [vmem:[#allocation8 + $0x118] sm:$0xff]  ;;  %v613_v55 = vld [vmem:[#allocation8 + $0x110] sm:$0xff]  ;;  %v580_v58 = vld [vmem:[#allocation8 + $0x8] sm:$0xff] }
  0x83   : > { %1816 = vmatpush3.msra.mxu1 %v618_v35  ;;  %1782 = vmatprep.subr.mxu0 %v601_v36  ;;  %v612_v59 = vld [vmem:[#allocation8 + $0x108] sm:$0xff]  ;;  %v595_v60 = vld [vmem:[#allocation8 + $0x80] sm:$0xff]  ;;  %v570_v1 = vld [vmem:[%s2614_s23 + $0x18] sm:$0xff] }
  0x84   : > { %1817 = vmatprep.subr.mxu1 %v633_v37  ;;  %1783 = vmatpush3.msra.mxu0 %v585_v38  ;;  %v627_v61 = vld [vmem:[#allocation8 + $0x180] sm:$0xff]  ;;  %v568_v63 = vld [vmem:[%s2614_s23 + $0x8] sm:$0xff]  ;;  %v569_v3 = vld [vmem:[%s2614_s23 + $0x10] sm:$0xff] }
  0x85   : > { %1818 = vmatpush3.msra.mxu1 %v617_v39  ;;  %1784 = vmatprep.subr.mxu0 %v600_v40  ;;  %v579_v62 = vld [vmem:[#allocation8] sm:$0xff]  ;;  %v674_v4 = vld [vmem:[#allocation8 + $0x2f8] sm:$0xff]  ;;  %v673_v8 = vld [vmem:[#allocation8 + $0x2f0] sm:$0xff] }
  0x86   : > { %1819 = vmatprep.subr.mxu1 %v632_v41  ;;  %1785 = vmatpush3.msra.mxu0 %v584_v42  ;;  %v611_v0 = vld [vmem:[#allocation8 + $0x100] sm:$0xff]  ;;  %v706_v5 = vld [vmem:[#allocation8 + $0x3f8] sm:$0xff]  ;;  %v705_v9 = vld [vmem:[#allocation8 + $0x3f0] sm:$0xff] }
  0x87   : > { %1820 = vmatpush3.msra.mxu1 %v616_v43  ;;  %1786 = vmatprep.subr.mxu0 %v599_v44  ;;  %v567_v2 = vld [vmem:[%s2614_s23] sm:$0xff]  ;;  %v658_v6 = vld [vmem:[#allocation8 + $0x278] sm:$0xff]  ;;  %v657_v10 = vld [vmem:[#allocation8 + $0x270] sm:$0xff] }
  0x88   : > { %1821 = vmatprep.subr.mxu1 %v631_v45  ;;  %1787 = vmatpush3.msra.mxu0 %v583_v46  ;;  %v690_v7 = vld [vmem:[#allocation8 + $0x378] sm:$0xff]  ;;  %v689_v11 = vld [vmem:[#allocation8 + $0x370] sm:$0xff]  ;;  %v672_v12 = vld [vmem:[#allocation8 + $0x2e8] sm:$0xff] }
  0x89   : > { %1822 = vmatpush3.msra.mxu1 %v615_v47  ;;  %1788 = vmatprep.subr.mxu0 %v598_v48  ;;  %v704_v13 = vld [vmem:[#allocation8 + $0x3e8] sm:$0xff]  ;;  %v671_v16 = vld [vmem:[#allocation8 + $0x2e0] sm:$0xff]  ;;  %v670_v20 = vld [vmem:[#allocation8 + $0x2d8] sm:$0xff] }
  0x8a   : > { %1823 = vmatprep.subr.mxu1 %v630_v49  ;;  %1789 = vmatpush3.msra.mxu0 %v582_v50  ;;  %v656_v14 = vld [vmem:[#allocation8 + $0x268] sm:$0xff]  ;;  %v703_v17 = vld [vmem:[#allocation8 + $0x3e0] sm:$0xff]  ;;  %v702_v21 = vld [vmem:[#allocation8 + $0x3d8] sm:$0xff] }
  0x8b   : > { %1824 = vmatpush3.msra.mxu1 %v614_v51  ;;  %1790 = vmatprep.subr.mxu0 %v597_v52  ;;  %v688_v15 = vld [vmem:[#allocation8 + $0x368] sm:$0xff]  ;;  %v655_v18 = vld [vmem:[#allocation8 + $0x260] sm:$0xff]  ;;  %v654_v22 = vld [vmem:[#allocation8 + $0x258] sm:$0xff] }
  0x8c   : > { %1825 = vmatprep.subr.mxu1 %v629_v53  ;;  %1791 = vmatpush3.msra.mxu0 %v581_v54  ;;  %v687_v19 = vld [vmem:[#allocation8 + $0x360] sm:$0xff]  ;;  %v686_v23 = vld [vmem:[#allocation8 + $0x358] sm:$0xff]  ;;  %v669_v24 = vld [vmem:[#allocation8 + $0x2d0] sm:$0xff] }
  0x8d   : > { %1826 = vmatpush3.msra.mxu1 %v613_v55  ;;  %1792 = vmatprep.subr.mxu0 %v596_v56  ;;  %v701_v25 = vld [vmem:[#allocation8 + $0x3d0] sm:$0xff]  ;;  %v668_v28 = vld [vmem:[#allocation8 + $0x2c8] sm:$0xff]  ;;  %v667_v32 = vld [vmem:[#allocation8 + $0x2c0] sm:$0xff] }
  0x8e   : > { %1827 = vmatprep.subr.mxu1 %v628_v57  ;;  %1793 = vmatpush3.msra.mxu0 %v580_v58  ;;  %v653_v26 = vld [vmem:[#allocation8 + $0x250] sm:$0xff]  ;;  %v700_v29 = vld [vmem:[#allocation8 + $0x3c8] sm:$0xff]  ;;  %v699_v33 = vld [vmem:[#allocation8 + $0x3c0] sm:$0xff] }
  0x8f   : > { %1828 = vmatpush3.msra.mxu1 %v612_v59  ;;  %1794 = vmatprep.subr.mxu0 %v595_v60  ;;  %v685_v27 = vld [vmem:[#allocation8 + $0x350] sm:$0xff]  ;;  %v652_v30 = vld [vmem:[#allocation8 + $0x248] sm:$0xff]  ;;  %v651_v34 = vld [vmem:[#allocation8 + $0x240] sm:$0xff] }
  0x90   : > { %1829 = vmatprep.subr.mxu1 %v627_v61  ;;  %1795 = vmatpush3.msra.mxu0 %v579_v62  ;;  %v684_v31 = vld [vmem:[#allocation8 + $0x348] sm:$0xff]  ;;  %v683_v35 = vld [vmem:[#allocation8 + $0x340] sm:$0xff]  ;;  %v666_v36 = vld [vmem:[#allocation8 + $0x2b8] sm:$0xff] }
  0x91   : > { %835 = vmatprep.mubr.f32.mxu0 %v568_v63  ;;  %1830 = vmatpush3.msra.mxu1 %v611_v0  ;;  %v698_v37 = vld [vmem:[#allocation8 + $0x3b8] sm:$0xff]  ;;  %v665_v40 = vld [vmem:[#allocation8 + $0x2b0] sm:$0xff]  ;;  %v664_v44 = vld [vmem:[#allocation8 + $0x2a8] sm:$0xff] }
  0x92   : > { %905 = vmatprep.mubr.f32.mxu1 %v570_v1  ;;  %836 = vmatmul.mubr.f32.vlgmr.msra.gmra.mxu0 %v567_v2  ;;  %v650_v38 = vld [vmem:[#allocation8 + $0x238] sm:$0xff]  ;;  %v697_v41 = vld [vmem:[#allocation8 + $0x3b0] sm:$0xff]  ;;  %v696_v45 = vld [vmem:[#allocation8 + $0x3a8] sm:$0xff] }
  0x93   : > { %906 = vmatmul.mubr.f32.vlgmr.msra.gmra.mxu1 %v569_v3  ;;  %1834 = vmatprep.subr.mxu0 %v674_v4  ;;  %v682_v39 = vld [vmem:[#allocation8 + $0x338] sm:$0xff]  ;;  %v649_v42 = vld [vmem:[#allocation8 + $0x230] sm:$0xff]  ;;  %v648_v46 = vld [vmem:[#allocation8 + $0x228] sm:$0xff] }
  0x94   : > { %1869 = vmatprep.subr.mxu1 %v706_v5  ;;  %1835 = vmatpush3.msra.mxu0 %v658_v6  ;;  %v681_v43 = vld [vmem:[#allocation8 + $0x330] sm:$0xff]  ;;  %v680_v47 = vld [vmem:[#allocation8 + $0x328] sm:$0xff]  ;;  %v663_v48 = vld [vmem:[#allocation8 + $0x2a0] sm:$0xff] }
  0x95   : > { %1870 = vmatpush3.msra.mxu1 %v690_v7  ;;  %1836 = vmatprep.subr.mxu0 %v673_v8  ;;  %v695_v49 = vld [vmem:[#allocation8 + $0x3a0] sm:$0xff]  ;;  %v662_v52 = vld [vmem:[#allocation8 + $0x298] sm:$0xff]  ;;  %v661_v56 = vld [vmem:[#allocation8 + $0x290] sm:$0xff] }
  0x96   : > { %1871 = vmatprep.subr.mxu1 %v705_v9  ;;  %1837 = vmatpush3.msra.mxu0 %v657_v10  ;;  %v647_v50 = vld [vmem:[#allocation8 + $0x220] sm:$0xff]  ;;  %v694_v53 = vld [vmem:[#allocation8 + $0x398] sm:$0xff]  ;;  %v693_v57 = vld [vmem:[#allocation8 + $0x390] sm:$0xff] }
  0x97   : > { %1872 = vmatpush3.msra.mxu1 %v689_v11  ;;  %1838 = vmatprep.subr.mxu0 %v672_v12  ;;  %v679_v51 = vld [vmem:[#allocation8 + $0x320] sm:$0xff]  ;;  %v646_v54 = vld [vmem:[#allocation8 + $0x218] sm:$0xff]  ;;  %v645_v58 = vld [vmem:[#allocation8 + $0x210] sm:$0xff] }
  0x98   : > { %1873 = vmatprep.subr.mxu1 %v704_v13  ;;  %1839 = vmatpush3.msra.mxu0 %v656_v14  ;;  %v678_v55 = vld [vmem:[#allocation8 + $0x318] sm:$0xff]  ;;  %v677_v59 = vld [vmem:[#allocation8 + $0x310] sm:$0xff]  ;;  %v660_v60 = vld [vmem:[#allocation8 + $0x288] sm:$0xff] }
  0x99   : > { %1874 = vmatpush3.msra.mxu1 %v688_v15  ;;  %1840 = vmatprep.subr.mxu0 %v671_v16  ;;  %v692_v61 = vld [vmem:[#allocation8 + $0x388] sm:$0xff]  ;;  %v659_v0 = vld [vmem:[#allocation8 + $0x280] sm:$0xff]  ;;  %v574_v6 = vld [vmem:[%s2614_s23 + $0x38] sm:$0xff] }
  0x9a   : > { %1875 = vmatprep.subr.mxu1 %v703_v17  ;;  %1841 = vmatpush3.msra.mxu0 %v655_v18  ;;  %v644_v62 = vld [vmem:[#allocation8 + $0x208] sm:$0xff]  ;;  %v691_v1 = vld [vmem:[#allocation8 + $0x380] sm:$0xff]  ;;  %v738_v7 = vld [vmem:[#allocation8 + $0x4f8] sm:$0xff] }
  0x9b   : > { %1876 = vmatpush3.msra.mxu1 %v687_v19  ;;  %1842 = vmatprep.subr.mxu0 %v670_v20  ;;  %v676_v63 = vld [vmem:[#allocation8 + $0x308] sm:$0xff]  ;;  %v643_v2 = vld [vmem:[#allocation8 + $0x200] sm:$0xff]  ;;  %v770_v8 = vld [vmem:[#allocation8 + $0x5f8] sm:$0xff] }
  0x9c   : > { %1877 = vmatprep.subr.mxu1 %v702_v21  ;;  %1843 = vmatpush3.msra.mxu0 %v654_v22  ;;  %v572_v3 = vld [vmem:[%s2614_s23 + $0x28] sm:$0xff]  ;;  %v675_v4 = vld [vmem:[#allocation8 + $0x300] sm:$0xff]  ;;  %v573_v9 = vld [vmem:[%s2614_s23 + $0x30] sm:$0xff] }
  0x9d   : > { %1878 = vmatpush3.msra.mxu1 %v686_v23  ;;  %1844 = vmatprep.subr.mxu0 %v669_v24  ;;  %v571_v5 = vld [vmem:[%s2614_s23 + $0x20] sm:$0xff]  ;;  %v722_v10 = vld [vmem:[#allocation8 + $0x478] sm:$0xff]  ;;  %v737_v12 = vld [vmem:[#allocation8 + $0x4f0] sm:$0xff] }
  0x9e   : > { %1879 = vmatprep.subr.mxu1 %v701_v25  ;;  %1845 = vmatpush3.msra.mxu0 %v653_v26  ;;  %v754_v11 = vld [vmem:[#allocation8 + $0x578] sm:$0xff]  ;;  %v769_v13 = vld [vmem:[#allocation8 + $0x5f0] sm:$0xff]  ;;  %v736_v16 = vld [vmem:[#allocation8 + $0x4e8] sm:$0xff] }
  0x9f   : > { %1880 = vmatpush3.msra.mxu1 %v685_v27  ;;  %1846 = vmatprep.subr.mxu0 %v668_v28  ;;  %v721_v14 = vld [vmem:[#allocation8 + $0x470] sm:$0xff]  ;;  %v768_v17 = vld [vmem:[#allocation8 + $0x5e8] sm:$0xff]  ;;  %v735_v20 = vld [vmem:[#allocation8 + $0x4e0] sm:$0xff] }
  0xa0   : > { %1881 = vmatprep.subr.mxu1 %v700_v29  ;;  %1847 = vmatpush3.msra.mxu0 %v652_v30  ;;  %v753_v15 = vld [vmem:[#allocation8 + $0x570] sm:$0xff]  ;;  %v720_v18 = vld [vmem:[#allocation8 + $0x468] sm:$0xff]  ;;  %v767_v21 = vld [vmem:[#allocation8 + $0x5e0] sm:$0xff] }
  0xa1   : > { %1882 = vmatpush3.msra.mxu1 %v684_v31  ;;  %1848 = vmatprep.subr.mxu0 %v667_v32  ;;  %v752_v19 = vld [vmem:[#allocation8 + $0x568] sm:$0xff]  ;;  %v719_v22 = vld [vmem:[#allocation8 + $0x460] sm:$0xff]  ;;  %v734_v24 = vld [vmem:[#allocation8 + $0x4d8] sm:$0xff] }
  0xa2   : > { %1883 = vmatprep.subr.mxu1 %v699_v33  ;;  %1849 = vmatpush3.msra.mxu0 %v651_v34  ;;  %v751_v23 = vld [vmem:[#allocation8 + $0x560] sm:$0xff]  ;;  %v766_v25 = vld [vmem:[#allocation8 + $0x5d8] sm:$0xff]  ;;  %v733_v28 = vld [vmem:[#allocation8 + $0x4d0] sm:$0xff] }
  0xa3   : > { %1884 = vmatpush3.msra.mxu1 %v683_v35  ;;  %1850 = vmatprep.subr.mxu0 %v666_v36  ;;  %v718_v26 = vld [vmem:[#allocation8 + $0x458] sm:$0xff]  ;;  %v765_v29 = vld [vmem:[#allocation8 + $0x5d0] sm:$0xff]  ;;  %v732_v32 = vld [vmem:[#allocation8 + $0x4c8] sm:$0xff] }
  0xa4   : > { %1885 = vmatprep.subr.mxu1 %v698_v37  ;;  %1851 = vmatpush3.msra.mxu0 %v650_v38  ;;  %v750_v27 = vld [vmem:[#allocation8 + $0x558] sm:$0xff]  ;;  %v717_v30 = vld [vmem:[#allocation8 + $0x450] sm:$0xff]  ;;  %v764_v33 = vld [vmem:[#allocation8 + $0x5c8] sm:$0xff] }
  0xa5   : > { %1886 = vmatpush3.msra.mxu1 %v682_v39  ;;  %1852 = vmatprep.subr.mxu0 %v665_v40  ;;  %v749_v31 = vld [vmem:[#allocation8 + $0x550] sm:$0xff]  ;;  %v716_v34 = vld [vmem:[#allocation8 + $0x448] sm:$0xff]  ;;  %v731_v36 = vld [vmem:[#allocation8 + $0x4c0] sm:$0xff] }
  0xa6   : > { %1887 = vmatprep.subr.mxu1 %v697_v41  ;;  %1853 = vmatpush3.msra.mxu0 %v649_v42  ;;  %v748_v35 = vld [vmem:[#allocation8 + $0x548] sm:$0xff]  ;;  %v763_v37 = vld [vmem:[#allocation8 + $0x5c0] sm:$0xff]  ;;  %v730_v40 = vld [vmem:[#allocation8 + $0x4b8] sm:$0xff] }
  0xa7   : > { %1888 = vmatpush3.msra.mxu1 %v681_v43  ;;  %1854 = vmatprep.subr.mxu0 %v664_v44  ;;  %v715_v38 = vld [vmem:[#allocation8 + $0x440] sm:$0xff]  ;;  %v762_v41 = vld [vmem:[#allocation8 + $0x5b8] sm:$0xff]  ;;  %v729_v44 = vld [vmem:[#allocation8 + $0x4b0] sm:$0xff] }
  0xa8   : > { %1889 = vmatprep.subr.mxu1 %v696_v45  ;;  %1855 = vmatpush3.msra.mxu0 %v648_v46  ;;  %v747_v39 = vld [vmem:[#allocation8 + $0x540] sm:$0xff]  ;;  %v714_v42 = vld [vmem:[#allocation8 + $0x438] sm:$0xff]  ;;  %v761_v45 = vld [vmem:[#allocation8 + $0x5b0] sm:$0xff] }
  0xa9   : > { %1890 = vmatpush3.msra.mxu1 %v680_v47  ;;  %1856 = vmatprep.subr.mxu0 %v663_v48  ;;  %v746_v43 = vld [vmem:[#allocation8 + $0x538] sm:$0xff]  ;;  %v713_v46 = vld [vmem:[#allocation8 + $0x430] sm:$0xff]  ;;  %v728_v48 = vld [vmem:[#allocation8 + $0x4a8] sm:$0xff] }
  0xaa   : > { %1891 = vmatprep.subr.mxu1 %v695_v49  ;;  %1857 = vmatpush3.msra.mxu0 %v647_v50  ;;  %v745_v47 = vld [vmem:[#allocation8 + $0x530] sm:$0xff]  ;;  %v760_v49 = vld [vmem:[#allocation8 + $0x5a8] sm:$0xff] }
  0xab   : > { %1892 = vmatpush3.msra.mxu1 %v679_v51  ;;  %1858 = vmatprep.subr.mxu0 %v662_v52  ;;  %v712_v50 = vld [vmem:[#allocation8 + $0x428] sm:$0xff]  ;;  %v727_v52 = vld [vmem:[#allocation8 + $0x4a0] sm:$0xff] }
  0xac   : > { %1893 = vmatprep.subr.mxu1 %v694_v53  ;;  %1859 = vmatpush3.msra.mxu0 %v646_v54  ;;  %v744_v51 = vld [vmem:[#allocation8 + $0x528] sm:$0xff]  ;;  %v759_v53 = vld [vmem:[#allocation8 + $0x5a0] sm:$0xff] }
  0xad   : > { %1894 = vmatpush3.msra.mxu1 %v678_v55  ;;  %1860 = vmatprep.subr.mxu0 %v661_v56  ;;  %v711_v54 = vld [vmem:[#allocation8 + $0x420] sm:$0xff]  ;;  %v726_v56 = vld [vmem:[#allocation8 + $0x498] sm:$0xff] }
  0xae   : > { %1895 = vmatprep.subr.mxu1 %v693_v57  ;;  %1861 = vmatpush3.msra.mxu0 %v645_v58  ;;  %v743_v55 = vld [vmem:[#allocation8 + $0x520] sm:$0xff]  ;;  %v758_v57 = vld [vmem:[#allocation8 + $0x598] sm:$0xff] }
  0xaf   : > { %1896 = vmatpush3.msra.mxu1 %v677_v59  ;;  %1862 = vmatprep.subr.mxu0 %v660_v60  ;;  %v710_v58 = vld [vmem:[#allocation8 + $0x418] sm:$0xff]  ;;  %v725_v60 = vld [vmem:[#allocation8 + $0x490] sm:$0xff] }
  0xb0   : > { %1897 = vmatprep.subr.mxu1 %v692_v61  ;;  %1863 = vmatpush3.msra.mxu0 %v644_v62  ;;  %v742_v59 = vld [vmem:[#allocation8 + $0x518] sm:$0xff]  ;;  %v757_v61 = vld [vmem:[#allocation8 + $0x590] sm:$0xff] }
  0xb1   : > { %1898 = vmatpush3.msra.mxu1 %v676_v63  ;;  %1864 = vmatprep.subr.mxu0 %v659_v0  ;;  %v709_v62 = vld [vmem:[#allocation8 + $0x410] sm:$0xff]  ;;  %v724_v0 = vld [vmem:[#allocation8 + $0x488] sm:$0xff] }
  0xb2   : > { %1899 = vmatprep.subr.mxu1 %v691_v1  ;;  %1865 = vmatpush3.msra.mxu0 %v643_v2  ;;  %v741_v63 = vld [vmem:[#allocation8 + $0x510] sm:$0xff]  ;;  %v756_v1 = vld [vmem:[#allocation8 + $0x588] sm:$0xff] }
  0xb3   : > { %975 = vmatprep.mubr.f32.mxu0 %v572_v3  ;;  %1900 = vmatpush3.msra.mxu1 %v675_v4  ;;  %v708_v2 = vld [vmem:[#allocation8 + $0x408] sm:$0xff]  ;;  %v723_v4 = vld [vmem:[#allocation8 + $0x480] sm:$0xff] }
  0xb4   : > { %976 = vmatmul.mubr.f32.vlgmr.msra.gmra.mxu0 %v571_v5  ;;  %1045 = vmatprep.mubr.f32.mxu1 %v574_v6  ;;  %v740_v3 = vld [vmem:[#allocation8 + $0x508] sm:$0xff]  ;;  %v755_v5 = vld [vmem:[#allocation8 + $0x580] sm:$0xff] }
  0xb5   : > { %1904 = vmatprep.subr.mxu0 %v738_v7  ;;  %1939 = vmatprep.subr.mxu1 %v770_v8  ;;  %v707_v6 = vld [vmem:[#allocation8 + $0x400] sm:$0xff]  ;;  %v576_v7 = vld [vmem:[%s2614_s23 + $0x48] sm:$0xff] }
  0xb6   : > { %1046 = vmatmul.mubr.f32.vlgmr.msra.gmra.mxu1 %v573_v9  ;;  %1905 = vmatpush3.msra.mxu0 %v722_v10  ;;  %v739_v8 = vld [vmem:[#allocation8 + $0x500] sm:$0xff]  ;;  %v578_v10 = vld [vmem:[%s2614_s23 + $0x58] sm:$0xff] }
  0xb7   : > { %1940 = vmatpush3.msra.mxu1 %v754_v11  ;;  %1906 = vmatprep.subr.mxu0 %v737_v12  ;;  %v575_v9 = vld [vmem:[%s2614_s23 + $0x40] sm:$0xff]  ;;  %v406_v11 = vld [vmem:[#allocation7 + $0xf8] sm:$0xff] }
  0xb8   : > { %1941 = vmatprep.subr.mxu1 %v769_v13  ;;  %1907 = vmatpush3.msra.mxu0 %v721_v14  ;;  %v438_v12 = vld [vmem:[#allocation7 + $0x1f8] sm:$0xff]  ;;  %v577_v13 = vld [vmem:[%s2614_s23 + $0x50] sm:$0xff] }
  0xb9   : > { %1942 = vmatpush3.msra.mxu1 %v753_v15  ;;  %1908 = vmatprep.subr.mxu0 %v736_v16  ;;  %v390_v14 = vld [vmem:[#allocation7 + $0x78] sm:$0xff]  ;;  %v405_v16 = vld [vmem:[#allocation7 + $0xf0] sm:$0xff] }
  0xba   : > { %1943 = vmatprep.subr.mxu1 %v768_v17  ;;  %1909 = vmatpush3.msra.mxu0 %v720_v18  ;;  %v422_v15 = vld [vmem:[#allocation7 + $0x178] sm:$0xff]  ;;  %v437_v17 = vld [vmem:[#allocation7 + $0x1f0] sm:$0xff] }
  0xbb   : > { %1944 = vmatpush3.msra.mxu1 %v752_v19  ;;  %1910 = vmatprep.subr.mxu0 %v735_v20  ;;  %v389_v18 = vld [vmem:[#allocation7 + $0x70] sm:$0xff]  ;;  %v404_v20 = vld [vmem:[#allocation7 + $0xe8] sm:$0xff] }
  0xbc   : > { %1945 = vmatprep.subr.mxu1 %v767_v21  ;;  %1911 = vmatpush3.msra.mxu0 %v719_v22  ;;  %v421_v19 = vld [vmem:[#allocation7 + $0x170] sm:$0xff]  ;;  %v436_v21 = vld [vmem:[#allocation7 + $0x1e8] sm:$0xff] }
  0xbd   : > { %1946 = vmatpush3.msra.mxu1 %v751_v23  ;;  %1912 = vmatprep.subr.mxu0 %v734_v24  ;;  %v388_v22 = vld [vmem:[#allocation7 + $0x68] sm:$0xff]  ;;  %v403_v24 = vld [vmem:[#allocation7 + $0xe0] sm:$0xff] }
  0xbe   : > { %1947 = vmatprep.subr.mxu1 %v766_v25  ;;  %1913 = vmatpush3.msra.mxu0 %v718_v26  ;;  %v420_v23 = vld [vmem:[#allocation7 + $0x168] sm:$0xff]  ;;  %v435_v25 = vld [vmem:[#allocation7 + $0x1e0] sm:$0xff] }
  0xbf   : > { %1948 = vmatpush3.msra.mxu1 %v750_v27  ;;  %1914 = vmatprep.subr.mxu0 %v733_v28  ;;  %v387_v26 = vld [vmem:[#allocation7 + $0x60] sm:$0xff]  ;;  %v402_v28 = vld [vmem:[#allocation7 + $0xd8] sm:$0xff] }
  0xc0   : > { %1949 = vmatprep.subr.mxu1 %v765_v29  ;;  %1915 = vmatpush3.msra.mxu0 %v717_v30  ;;  %v419_v27 = vld [vmem:[#allocation7 + $0x160] sm:$0xff]  ;;  %v434_v29 = vld [vmem:[#allocation7 + $0x1d8] sm:$0xff] }
  0xc1   : > { %1950 = vmatpush3.msra.mxu1 %v749_v31  ;;  %1916 = vmatprep.subr.mxu0 %v732_v32  ;;  %v386_v30 = vld [vmem:[#allocation7 + $0x58] sm:$0xff]  ;;  %v401_v32 = vld [vmem:[#allocation7 + $0xd0] sm:$0xff] }
  0xc2   : > { %1951 = vmatprep.subr.mxu1 %v764_v33  ;;  %1917 = vmatpush3.msra.mxu0 %v716_v34  ;;  %v418_v31 = vld [vmem:[#allocation7 + $0x158] sm:$0xff]  ;;  %v433_v33 = vld [vmem:[#allocation7 + $0x1d0] sm:$0xff] }
  0xc3   : > { %1952 = vmatpush3.msra.mxu1 %v748_v35  ;;  %1918 = vmatprep.subr.mxu0 %v731_v36  ;;  %v385_v34 = vld [vmem:[#allocation7 + $0x50] sm:$0xff]  ;;  %v400_v36 = vld [vmem:[#allocation7 + $0xc8] sm:$0xff] }
  0xc4   : > { %1953 = vmatprep.subr.mxu1 %v763_v37  ;;  %1919 = vmatpush3.msra.mxu0 %v715_v38  ;;  %v417_v35 = vld [vmem:[#allocation7 + $0x150] sm:$0xff]  ;;  %v432_v37 = vld [vmem:[#allocation7 + $0x1c8] sm:$0xff] }
  0xc5   : > { %1954 = vmatpush3.msra.mxu1 %v747_v39  ;;  %1920 = vmatprep.subr.mxu0 %v730_v40  ;;  %v384_v38 = vld [vmem:[#allocation7 + $0x48] sm:$0xff]  ;;  %v399_v40 = vld [vmem:[#allocation7 + $0xc0] sm:$0xff] }
  0xc6   : > { %1955 = vmatprep.subr.mxu1 %v762_v41  ;;  %1921 = vmatpush3.msra.mxu0 %v714_v42  ;;  %v416_v39 = vld [vmem:[#allocation7 + $0x148] sm:$0xff]  ;;  %v431_v41 = vld [vmem:[#allocation7 + $0x1c0] sm:$0xff] }
  0xc7   : > { %1956 = vmatpush3.msra.mxu1 %v746_v43  ;;  %1922 = vmatprep.subr.mxu0 %v729_v44  ;;  %v383_v42 = vld [vmem:[#allocation7 + $0x40] sm:$0xff]  ;;  %v398_v44 = vld [vmem:[#allocation7 + $0xb8] sm:$0xff] }
  0xc8   : > { %1957 = vmatprep.subr.mxu1 %v761_v45  ;;  %1923 = vmatpush3.msra.mxu0 %v713_v46  ;;  %v415_v43 = vld [vmem:[#allocation7 + $0x140] sm:$0xff]  ;;  %v430_v45 = vld [vmem:[#allocation7 + $0x1b8] sm:$0xff] }
  0xc9   : > { %1958 = vmatpush3.msra.mxu1 %v745_v47  ;;  %1924 = vmatprep.subr.mxu0 %v728_v48  ;;  %v382_v46 = vld [vmem:[#allocation7 + $0x38] sm:$0xff]  ;;  %v397_v48 = vld [vmem:[#allocation7 + $0xb0] sm:$0xff] }
  0xca   : > { %1959 = vmatprep.subr.mxu1 %v760_v49  ;;  %1925 = vmatpush3.msra.mxu0 %v712_v50  ;;  %v414_v47 = vld [vmem:[#allocation7 + $0x138] sm:$0xff]  ;;  %v429_v49 = vld [vmem:[#allocation7 + $0x1b0] sm:$0xff] }
  0xcb   : > { %1960 = vmatpush3.msra.mxu1 %v744_v51  ;;  %1926 = vmatprep.subr.mxu0 %v727_v52  ;;  %v381_v50 = vld [vmem:[#allocation7 + $0x30] sm:$0xff]  ;;  %v396_v52 = vld [vmem:[#allocation7 + $0xa8] sm:$0xff] }
  0xcc   : > { %1961 = vmatprep.subr.mxu1 %v759_v53  ;;  %1927 = vmatpush3.msra.mxu0 %v711_v54  ;;  %v413_v51 = vld [vmem:[#allocation7 + $0x130] sm:$0xff]  ;;  %v428_v53 = vld [vmem:[#allocation7 + $0x1a8] sm:$0xff] }
  0xcd   : > { %1962 = vmatpush3.msra.mxu1 %v743_v55  ;;  %1928 = vmatprep.subr.mxu0 %v726_v56  ;;  %v380_v54 = vld [vmem:[#allocation7 + $0x28] sm:$0xff]  ;;  %v395_v56 = vld [vmem:[#allocation7 + $0xa0] sm:$0xff] }
  0xce   : > { %1963 = vmatprep.subr.mxu1 %v758_v57  ;;  %1929 = vmatpush3.msra.mxu0 %v710_v58  ;;  %v412_v55 = vld [vmem:[#allocation7 + $0x128] sm:$0xff]  ;;  %v427_v57 = vld [vmem:[#allocation7 + $0x1a0] sm:$0xff] }
  0xcf   : > { %1964 = vmatpush3.msra.mxu1 %v742_v59  ;;  %1930 = vmatprep.subr.mxu0 %v725_v60  ;;  %v379_v58 = vld [vmem:[#allocation7 + $0x20] sm:$0xff]  ;;  %v394_v60 = vld [vmem:[#allocation7 + $0x98] sm:$0xff] }
  0xd0   : > { %1965 = vmatprep.subr.mxu1 %v757_v61  ;;  %1931 = vmatpush3.msra.mxu0 %v709_v62  ;;  %v411_v59 = vld [vmem:[#allocation7 + $0x120] sm:$0xff]  ;;  %v426_v61 = vld [vmem:[#allocation7 + $0x198] sm:$0xff] }
  0xd1   : > { %1966 = vmatpush3.msra.mxu1 %v741_v63  ;;  %1932 = vmatprep.subr.mxu0 %v724_v0  ;;  %v378_v62 = vld [vmem:[#allocation7 + $0x18] sm:$0xff]  ;;  %v393_v0 = vld [vmem:[#allocation7 + $0x90] sm:$0xff] }
  0xd2   : > { %1967 = vmatprep.subr.mxu1 %v756_v1  ;;  %1933 = vmatpush3.msra.mxu0 %v708_v2  ;;  %v410_v63 = vld [vmem:[#allocation7 + $0x118] sm:$0xff]  ;;  %v425_v1 = vld [vmem:[#allocation7 + $0x190] sm:$0xff] }
  0xd3   : > { %1968 = vmatpush3.msra.mxu1 %v740_v3  ;;  %1934 = vmatprep.subr.mxu0 %v723_v4  ;;  %v377_v2 = vld [vmem:[#allocation7 + $0x10] sm:$0xff]  ;;  %v392_v4 = vld [vmem:[#allocation7 + $0x88] sm:$0xff] }
  0xd4   : > { %1969 = vmatprep.subr.mxu1 %v755_v5  ;;  %1935 = vmatpush3.msra.mxu0 %v707_v6  ;;  %v409_v3 = vld [vmem:[#allocation7 + $0x110] sm:$0xff]  ;;  %v424_v5 = vld [vmem:[#allocation7 + $0x188] sm:$0xff] }
  0xd5   : > { %1115 = vmatprep.mubr.f32.mxu0 %v576_v7  ;;  %1970 = vmatpush3.msra.mxu1 %v739_v8  ;;  %v376_v6 = vld [vmem:[#allocation7 + $0x8] sm:$0xff]  ;;  %v391_v8 = vld [vmem:[#allocation7 + $0x80] sm:$0xff] }
  0xd6   : > { %1116 = vmatmul.mubr.f32.vlgmr.msra.gmra.mxu0 %v575_v9  ;;  %1185 = vmatprep.mubr.f32.mxu1 %v578_v10  ;;  %v408_v7 = vld [vmem:[#allocation7 + $0x108] sm:$0xff]  ;;  %v423_v9 = vld [vmem:[#allocation7 + $0x180] sm:$0xff] }
  0xd7   : > { %1974 = vmatprep.subr.mxu0 %v406_v11  ;;  %2009 = vmatprep.subr.mxu1 %v438_v12  ;;  %v375_v10 = vld [vmem:[#allocation7] sm:$0xff]  ;;  %v364_v11 = vld [vmem:[%s2607_s14 + $0x8] sm:$0xff] }
  0xd8   : > { %1186 = vmatmul.mubr.f32.vlgmr.msra.gmra.mxu1 %v577_v13  ;;  %1975 = vmatpush3.msra.mxu0 %v390_v14  ;;  %v407_v12 = vld [vmem:[#allocation7 + $0x100] sm:$0xff]  ;;  %v366_v14 = vld [vmem:[%s2607_s14 + $0x18] sm:$0xff] }
  0xd9   : > { %2010 = vmatpush3.msra.mxu1 %v422_v15  ;;  %1976 = vmatprep.subr.mxu0 %v405_v16  ;;  %v363_v13 = vld [vmem:[%s2607_s14] sm:$0xff]  ;;  %v470_v15 = vld [vmem:[#allocation7 + $0x2f8] sm:$0xff] }
  0xda   : > { %2011 = vmatprep.subr.mxu1 %v437_v17  ;;  %1977 = vmatpush3.msra.mxu0 %v389_v18  ;;  %v502_v16 = vld [vmem:[#allocation7 + $0x3f8] sm:$0xff]  ;;  %v365_v17 = vld [vmem:[%s2607_s14 + $0x10] sm:$0xff] }
  0xdb   : > { %2012 = vmatpush3.msra.mxu1 %v421_v19  ;;  %1978 = vmatprep.subr.mxu0 %v404_v20  ;;  %v454_v18 = vld [vmem:[#allocation7 + $0x278] sm:$0xff]  ;;  %v469_v20 = vld [vmem:[#allocation7 + $0x2f0] sm:$0xff] }
  0xdc   : > { %2013 = vmatprep.subr.mxu1 %v436_v21  ;;  %1979 = vmatpush3.msra.mxu0 %v388_v22  ;;  %v486_v19 = vld [vmem:[#allocation7 + $0x378] sm:$0xff]  ;;  %v501_v21 = vld [vmem:[#allocation7 + $0x3f0] sm:$0xff] }
  0xdd   : > { %2014 = vmatpush3.msra.mxu1 %v420_v23  ;;  %1980 = vmatprep.subr.mxu0 %v403_v24  ;;  %v453_v22 = vld [vmem:[#allocation7 + $0x270] sm:$0xff]  ;;  %v468_v24 = vld [vmem:[#allocation7 + $0x2e8] sm:$0xff] }
  0xde   : > { %2015 = vmatprep.subr.mxu1 %v435_v25  ;;  %1981 = vmatpush3.msra.mxu0 %v387_v26  ;;  %v485_v23 = vld [vmem:[#allocation7 + $0x370] sm:$0xff]  ;;  %v500_v25 = vld [vmem:[#allocation7 + $0x3e8] sm:$0xff] }
  0xdf   : > { %2016 = vmatpush3.msra.mxu1 %v419_v27  ;;  %1982 = vmatprep.subr.mxu0 %v402_v28  ;;  %v452_v26 = vld [vmem:[#allocation7 + $0x268] sm:$0xff]  ;;  %v467_v28 = vld [vmem:[#allocation7 + $0x2e0] sm:$0xff] }
  0xe0   : > { %2017 = vmatprep.subr.mxu1 %v434_v29  ;;  %1983 = vmatpush3.msra.mxu0 %v386_v30  ;;  %v484_v27 = vld [vmem:[#allocation7 + $0x368] sm:$0xff]  ;;  %v499_v29 = vld [vmem:[#allocation7 + $0x3e0] sm:$0xff] }
  0xe1   : > { %2018 = vmatpush3.msra.mxu1 %v418_v31  ;;  %1984 = vmatprep.subr.mxu0 %v401_v32  ;;  %v451_v30 = vld [vmem:[#allocation7 + $0x260] sm:$0xff]  ;;  %v466_v32 = vld [vmem:[#allocation7 + $0x2d8] sm:$0xff] }
  0xe2   : > { %2019 = vmatprep.subr.mxu1 %v433_v33  ;;  %1985 = vmatpush3.msra.mxu0 %v385_v34  ;;  %v483_v31 = vld [vmem:[#allocation7 + $0x360] sm:$0xff]  ;;  %v498_v33 = vld [vmem:[#allocation7 + $0x3d8] sm:$0xff] }
  0xe3   : > { %2020 = vmatpush3.msra.mxu1 %v417_v35  ;;  %1986 = vmatprep.subr.mxu0 %v400_v36  ;;  %v450_v34 = vld [vmem:[#allocation7 + $0x258] sm:$0xff]  ;;  %v465_v36 = vld [vmem:[#allocation7 + $0x2d0] sm:$0xff] }
  0xe4   : > { %2021 = vmatprep.subr.mxu1 %v432_v37  ;;  %1987 = vmatpush3.msra.mxu0 %v384_v38  ;;  %v482_v35 = vld [vmem:[#allocation7 + $0x358] sm:$0xff]  ;;  %v497_v37 = vld [vmem:[#allocation7 + $0x3d0] sm:$0xff] }
  0xe5   : > { %2022 = vmatpush3.msra.mxu1 %v416_v39  ;;  %1988 = vmatprep.subr.mxu0 %v399_v40  ;;  %v449_v38 = vld [vmem:[#allocation7 + $0x250] sm:$0xff]  ;;  %v464_v40 = vld [vmem:[#allocation7 + $0x2c8] sm:$0xff] }
  0xe6   : > { %2023 = vmatprep.subr.mxu1 %v431_v41  ;;  %1989 = vmatpush3.msra.mxu0 %v383_v42  ;;  %v481_v39 = vld [vmem:[#allocation7 + $0x350] sm:$0xff]  ;;  %v496_v41 = vld [vmem:[#allocation7 + $0x3c8] sm:$0xff] }
  0xe7   : > { %2024 = vmatpush3.msra.mxu1 %v415_v43  ;;  %1990 = vmatprep.subr.mxu0 %v398_v44  ;;  %v448_v42 = vld [vmem:[#allocation7 + $0x248] sm:$0xff]  ;;  %v463_v44 = vld [vmem:[#allocation7 + $0x2c0] sm:$0xff] }
  0xe8   : > { %2025 = vmatprep.subr.mxu1 %v430_v45  ;;  %1991 = vmatpush3.msra.mxu0 %v382_v46  ;;  %v480_v43 = vld [vmem:[#allocation7 + $0x348] sm:$0xff]  ;;  %v495_v45 = vld [vmem:[#allocation7 + $0x3c0] sm:$0xff] }
  0xe9   : > { %2026 = vmatpush3.msra.mxu1 %v414_v47  ;;  %1992 = vmatprep.subr.mxu0 %v397_v48  ;;  %v447_v46 = vld [vmem:[#allocation7 + $0x240] sm:$0xff]  ;;  %v462_v48 = vld [vmem:[#allocation7 + $0x2b8] sm:$0xff] }
  0xea   : > { %2027 = vmatprep.subr.mxu1 %v429_v49  ;;  %1993 = vmatpush3.msra.mxu0 %v381_v50  ;;  %v479_v47 = vld [vmem:[#allocation7 + $0x340] sm:$0xff]  ;;  %v494_v49 = vld [vmem:[#allocation7 + $0x3b8] sm:$0xff] }
  0xeb   : > { %2028 = vmatpush3.msra.mxu1 %v413_v51  ;;  %1994 = vmatprep.subr.mxu0 %v396_v52  ;;  %v446_v50 = vld [vmem:[#allocation7 + $0x238] sm:$0xff]  ;;  %v461_v52 = vld [vmem:[#allocation7 + $0x2b0] sm:$0xff] }
  0xec   : > { %2029 = vmatprep.subr.mxu1 %v428_v53  ;;  %1995 = vmatpush3.msra.mxu0 %v380_v54  ;;  %v478_v51 = vld [vmem:[#allocation7 + $0x338] sm:$0xff]  ;;  %v493_v53 = vld [vmem:[#allocation7 + $0x3b0] sm:$0xff] }
  0xed   : > { %2030 = vmatpush3.msra.mxu1 %v412_v55  ;;  %1996 = vmatprep.subr.mxu0 %v395_v56  ;;  %v445_v54 = vld [vmem:[#allocation7 + $0x230] sm:$0xff]  ;;  %v460_v56 = vld [vmem:[#allocation7 + $0x2a8] sm:$0xff] }
  0xee   : > { %2031 = vmatprep.subr.mxu1 %v427_v57  ;;  %1997 = vmatpush3.msra.mxu0 %v379_v58  ;;  %v477_v55 = vld [vmem:[#allocation7 + $0x330] sm:$0xff]  ;;  %v492_v57 = vld [vmem:[#allocation7 + $0x3a8] sm:$0xff] }
  0xef   : > { %2032 = vmatpush3.msra.mxu1 %v411_v59  ;;  %1998 = vmatprep.subr.mxu0 %v394_v60  ;;  %v444_v58 = vld [vmem:[#allocation7 + $0x228] sm:$0xff]  ;;  %v459_v60 = vld [vmem:[#allocation7 + $0x2a0] sm:$0xff] }
  0xf0   : > { %2033 = vmatprep.subr.mxu1 %v426_v61  ;;  %1999 = vmatpush3.msra.mxu0 %v378_v62  ;;  %v476_v59 = vld [vmem:[#allocation7 + $0x328] sm:$0xff]  ;;  %v491_v61 = vld [vmem:[#allocation7 + $0x3a0] sm:$0xff] }
  0xf1   : > { %2034 = vmatpush3.msra.mxu1 %v410_v63  ;;  %2000 = vmatprep.subr.mxu0 %v393_v0  ;;  %v443_v62 = vld [vmem:[#allocation7 + $0x220] sm:$0xff]  ;;  %v458_v0 = vld [vmem:[#allocation7 + $0x298] sm:$0xff] }
  0xf2   : > { %2035 = vmatprep.subr.mxu1 %v425_v1  ;;  %2001 = vmatpush3.msra.mxu0 %v377_v2  ;;  %v475_v63 = vld [vmem:[#allocation7 + $0x320] sm:$0xff]  ;;  %v490_v1 = vld [vmem:[#allocation7 + $0x398] sm:$0xff] }
  0xf3   : > { %2036 = vmatpush3.msra.mxu1 %v409_v3  ;;  %2002 = vmatprep.subr.mxu0 %v392_v4  ;;  %v442_v2 = vld [vmem:[#allocation7 + $0x218] sm:$0xff]  ;;  %v457_v4 = vld [vmem:[#allocation7 + $0x290] sm:$0xff] }
  0xf4   : > { %2037 = vmatprep.subr.mxu1 %v424_v5  ;;  %2003 = vmatpush3.msra.mxu0 %v376_v6  ;;  %v474_v3 = vld [vmem:[#allocation7 + $0x318] sm:$0xff]  ;;  %v489_v5 = vld [vmem:[#allocation7 + $0x390] sm:$0xff] }
  0xf5   : > { %2038 = vmatpush3.msra.mxu1 %v408_v7  ;;  %2004 = vmatprep.subr.mxu0 %v391_v8  ;;  %v441_v6 = vld [vmem:[#allocation7 + $0x210] sm:$0xff]  ;;  %v456_v8 = vld [vmem:[#allocation7 + $0x288] sm:$0xff] }
  0xf6   : > { %2039 = vmatprep.subr.mxu1 %v423_v9  ;;  %2005 = vmatpush3.msra.mxu0 %v375_v10  ;;  %v473_v7 = vld [vmem:[#allocation7 + $0x310] sm:$0xff]  ;;  %v488_v9 = vld [vmem:[#allocation7 + $0x388] sm:$0xff] }
  0xf7   : > { %1255 = vmatprep.mubr.f32.mxu0 %v364_v11  ;;  %2040 = vmatpush3.msra.mxu1 %v407_v12  ;;  %v440_v10 = vld [vmem:[#allocation7 + $0x208] sm:$0xff]  ;;  %v455_v12 = vld [vmem:[#allocation7 + $0x280] sm:$0xff] }
  0xf8   : > { %1256 = vmatmul.mubr.f32.vlgmr.msra.gmra.mxu0 %v363_v13  ;;  %1325 = vmatprep.mubr.f32.mxu1 %v366_v14  ;;  %v472_v11 = vld [vmem:[#allocation7 + $0x308] sm:$0xff]  ;;  %v487_v13 = vld [vmem:[#allocation7 + $0x380] sm:$0xff] }
  0xf9   : > { %2044 = vmatprep.subr.mxu0 %v470_v15  ;;  %2079 = vmatprep.subr.mxu1 %v502_v16  ;;  %v439_v14 = vld [vmem:[#allocation7 + $0x200] sm:$0xff]  ;;  %v368_v15 = vld [vmem:[%s2607_s14 + $0x28] sm:$0xff] }
  0xfa   : > { %1326 = vmatmul.mubr.f32.vlgmr.msra.gmra.mxu1 %v365_v17  ;;  %2045 = vmatpush3.msra.mxu0 %v454_v18  ;;  %v471_v16 = vld [vmem:[#allocation7 + $0x300] sm:$0xff]  ;;  %v370_v18 = vld [vmem:[%s2607_s14 + $0x38] sm:$0xff] }
  0xfb   : > { %2080 = vmatpush3.msra.mxu1 %v486_v19  ;;  %2046 = vmatprep.subr.mxu0 %v469_v20  ;;  %v367_v17 = vld [vmem:[%s2607_s14 + $0x20] sm:$0xff]  ;;  %v534_v19 = vld [vmem:[#allocation7 + $0x4f8] sm:$0xff] }
  0xfc   : > { %2081 = vmatprep.subr.mxu1 %v501_v21  ;;  %2047 = vmatpush3.msra.mxu0 %v453_v22  ;;  %v566_v20 = vld [vmem:[#allocation7 + $0x5f8] sm:$0xff]  ;;  %v369_v21 = vld [vmem:[%s2607_s14 + $0x30] sm:$0xff] }
  0xfd   : > { %2082 = vmatpush3.msra.mxu1 %v485_v23  ;;  %2048 = vmatprep.subr.mxu0 %v468_v24  ;;  %v518_v22 = vld [vmem:[#allocation7 + $0x478] sm:$0xff]  ;;  %v533_v24 = vld [vmem:[#allocation7 + $0x4f0] sm:$0xff] }
  0xfe   : > { %2083 = vmatprep.subr.mxu1 %v500_v25  ;;  %2049 = vmatpush3.msra.mxu0 %v452_v26  ;;  %v550_v23 = vld [vmem:[#allocation7 + $0x578] sm:$0xff]  ;;  %v565_v25 = vld [vmem:[#allocation7 + $0x5f0] sm:$0xff] }
  0xff   : > { %2084 = vmatpush3.msra.mxu1 %v484_v27  ;;  %2050 = vmatprep.subr.mxu0 %v467_v28  ;;  %v517_v26 = vld [vmem:[#allocation7 + $0x470] sm:$0xff]  ;;  %v532_v28 = vld [vmem:[#allocation7 + $0x4e8] sm:$0xff] }
 0x100   : > { %2085 = vmatprep.subr.mxu1 %v499_v29  ;;  %2051 = vmatpush3.msra.mxu0 %v451_v30  ;;  %v549_v27 = vld [vmem:[#allocation7 + $0x570] sm:$0xff]  ;;  %v564_v29 = vld [vmem:[#allocation7 + $0x5e8] sm:$0xff] }
 0x101   : > { %2086 = vmatpush3.msra.mxu1 %v483_v31  ;;  %2052 = vmatprep.subr.mxu0 %v466_v32  ;;  %v516_v30 = vld [vmem:[#allocation7 + $0x468] sm:$0xff]  ;;  %v531_v32 = vld [vmem:[#allocation7 + $0x4e0] sm:$0xff] }
 0x102   : > { %2087 = vmatprep.subr.mxu1 %v498_v33  ;;  %2053 = vmatpush3.msra.mxu0 %v450_v34  ;;  %v548_v31 = vld [vmem:[#allocation7 + $0x568] sm:$0xff]  ;;  %v563_v33 = vld [vmem:[#allocation7 + $0x5e0] sm:$0xff] }
 0x103   : > { %2088 = vmatpush3.msra.mxu1 %v482_v35  ;;  %2054 = vmatprep.subr.mxu0 %v465_v36  ;;  %v515_v34 = vld [vmem:[#allocation7 + $0x460] sm:$0xff]  ;;  %v530_v36 = vld [vmem:[#allocation7 + $0x4d8] sm:$0xff] }
 0x104   : > { %2089 = vmatprep.subr.mxu1 %v497_v37  ;;  %2055 = vmatpush3.msra.mxu0 %v449_v38  ;;  %v547_v35 = vld [vmem:[#allocation7 + $0x560] sm:$0xff]  ;;  %v562_v37 = vld [vmem:[#allocation7 + $0x5d8] sm:$0xff] }
 0x105   : > { %2090 = vmatpush3.msra.mxu1 %v481_v39  ;;  %2056 = vmatprep.subr.mxu0 %v464_v40  ;;  %v514_v38 = vld [vmem:[#allocation7 + $0x458] sm:$0xff]  ;;  %v529_v40 = vld [vmem:[#allocation7 + $0x4d0] sm:$0xff] }
 0x106   : > { %2091 = vmatprep.subr.mxu1 %v496_v41  ;;  %2057 = vmatpush3.msra.mxu0 %v448_v42  ;;  %v546_v39 = vld [vmem:[#allocation7 + $0x558] sm:$0xff]  ;;  %v561_v41 = vld [vmem:[#allocation7 + $0x5d0] sm:$0xff] }
 0x107   : > { %2092 = vmatpush3.msra.mxu1 %v480_v43  ;;  %2058 = vmatprep.subr.mxu0 %v463_v44  ;;  %v513_v42 = vld [vmem:[#allocation7 + $0x450] sm:$0xff]  ;;  %v528_v44 = vld [vmem:[#allocation7 + $0x4c8] sm:$0xff] }
 0x108   : > { %2093 = vmatprep.subr.mxu1 %v495_v45  ;;  %2059 = vmatpush3.msra.mxu0 %v447_v46  ;;  %v545_v43 = vld [vmem:[#allocation7 + $0x550] sm:$0xff]  ;;  %v560_v45 = vld [vmem:[#allocation7 + $0x5c8] sm:$0xff] }
 0x109   : > { %2094 = vmatpush3.msra.mxu1 %v479_v47  ;;  %2060 = vmatprep.subr.mxu0 %v462_v48  ;;  %v512_v46 = vld [vmem:[#allocation7 + $0x448] sm:$0xff]  ;;  %v527_v48 = vld [vmem:[#allocation7 + $0x4c0] sm:$0xff] }
 0x10a   : > { %2095 = vmatprep.subr.mxu1 %v494_v49  ;;  %2061 = vmatpush3.msra.mxu0 %v446_v50  ;;  %v544_v47 = vld [vmem:[#allocation7 + $0x548] sm:$0xff]  ;;  %v559_v49 = vld [vmem:[#allocation7 + $0x5c0] sm:$0xff] }
 0x10b   : > { %2096 = vmatpush3.msra.mxu1 %v478_v51  ;;  %2062 = vmatprep.subr.mxu0 %v461_v52  ;;  %v511_v50 = vld [vmem:[#allocation7 + $0x440] sm:$0xff]  ;;  %v526_v52 = vld [vmem:[#allocation7 + $0x4b8] sm:$0xff] }
 0x10c   : > { %2097 = vmatprep.subr.mxu1 %v493_v53  ;;  %2063 = vmatpush3.msra.mxu0 %v445_v54  ;;  %v543_v51 = vld [vmem:[#allocation7 + $0x540] sm:$0xff]  ;;  %v558_v53 = vld [vmem:[#allocation7 + $0x5b8] sm:$0xff] }
 0x10d   : > { %2098 = vmatpush3.msra.mxu1 %v477_v55  ;;  %2064 = vmatprep.subr.mxu0 %v460_v56  ;;  %v510_v54 = vld [vmem:[#allocation7 + $0x438] sm:$0xff]  ;;  %v525_v56 = vld [vmem:[#allocation7 + $0x4b0] sm:$0xff] }
 0x10e   : > { %2099 = vmatprep.subr.mxu1 %v492_v57  ;;  %2065 = vmatpush3.msra.mxu0 %v444_v58  ;;  %v542_v55 = vld [vmem:[#allocation7 + $0x538] sm:$0xff]  ;;  %v557_v57 = vld [vmem:[#allocation7 + $0x5b0] sm:$0xff] }
 0x10f   : > { %2100 = vmatpush3.msra.mxu1 %v476_v59  ;;  %2066 = vmatprep.subr.mxu0 %v459_v60  ;;  %v509_v58 = vld [vmem:[#allocation7 + $0x430] sm:$0xff]  ;;  %v524_v60 = vld [vmem:[#allocation7 + $0x4a8] sm:$0xff] }
 0x110   : > { %2101 = vmatprep.subr.mxu1 %v491_v61  ;;  %2067 = vmatpush3.msra.mxu0 %v443_v62  ;;  %v541_v59 = vld [vmem:[#allocation7 + $0x530] sm:$0xff]  ;;  %v556_v61 = vld [vmem:[#allocation7 + $0x5a8] sm:$0xff] }
 0x111   : > { %2102 = vmatpush3.msra.mxu1 %v475_v63  ;;  %2068 = vmatprep.subr.mxu0 %v458_v0  ;;  %v508_v62 = vld [vmem:[#allocation7 + $0x428] sm:$0xff]  ;;  %v523_v0 = vld [vmem:[#allocation7 + $0x4a0] sm:$0xff] }
 0x112   : > { %2103 = vmatprep.subr.mxu1 %v490_v1  ;;  %2069 = vmatpush3.msra.mxu0 %v442_v2  ;;  %v540_v63 = vld [vmem:[#allocation7 + $0x528] sm:$0xff]  ;;  %v555_v1 = vld [vmem:[#allocation7 + $0x5a0] sm:$0xff] }
 0x113   : > { %2104 = vmatpush3.msra.mxu1 %v474_v3  ;;  %2070 = vmatprep.subr.mxu0 %v457_v4  ;;  %v507_v2 = vld [vmem:[#allocation7 + $0x420] sm:$0xff]  ;;  %v522_v4 = vld [vmem:[#allocation7 + $0x498] sm:$0xff] }
 0x114   : > { %2105 = vmatprep.subr.mxu1 %v489_v5  ;;  %2071 = vmatpush3.msra.mxu0 %v441_v6  ;;  %v539_v3 = vld [vmem:[#allocation7 + $0x520] sm:$0xff]  ;;  %v554_v5 = vld [vmem:[#allocation7 + $0x598] sm:$0xff] }
 0x115   : > { %2106 = vmatpush3.msra.mxu1 %v473_v7  ;;  %2072 = vmatprep.subr.mxu0 %v456_v8  ;;  %v506_v6 = vld [vmem:[#allocation7 + $0x418] sm:$0xff]  ;;  %v521_v8 = vld [vmem:[#allocation7 + $0x490] sm:$0xff] }
 0x116   : > { %2107 = vmatprep.subr.mxu1 %v488_v9  ;;  %2073 = vmatpush3.msra.mxu0 %v440_v10  ;;  %v538_v7 = vld [vmem:[#allocation7 + $0x518] sm:$0xff]  ;;  %v553_v9 = vld [vmem:[#allocation7 + $0x590] sm:$0xff] }
 0x117   : > { %2108 = vmatpush3.msra.mxu1 %v472_v11  ;;  %2074 = vmatprep.subr.mxu0 %v455_v12  ;;  %v505_v10 = vld [vmem:[#allocation7 + $0x410] sm:$0xff]  ;;  %v520_v12 = vld [vmem:[#allocation7 + $0x488] sm:$0xff] }
 0x118   : > { %2109 = vmatprep.subr.mxu1 %v487_v13  ;;  %2075 = vmatpush3.msra.mxu0 %v439_v14  ;;  %v537_v11 = vld [vmem:[#allocation7 + $0x510] sm:$0xff]  ;;  %v552_v13 = vld [vmem:[#allocation7 + $0x588] sm:$0xff] }
 0x119   : > { %1395 = vmatprep.mubr.f32.mxu0 %v368_v15  ;;  %2110 = vmatpush3.msra.mxu1 %v471_v16  ;;  %v504_v14 = vld [vmem:[#allocation7 + $0x408] sm:$0xff]  ;;  %v519_v16 = vld [vmem:[#allocation7 + $0x480] sm:$0xff] }
 0x11a   : > { %1396 = vmatmul.mubr.f32.vlgmr.msra.gmra.mxu0 %v367_v17  ;;  %1465 = vmatprep.mubr.f32.mxu1 %v370_v18  ;;  %v536_v15 = vld [vmem:[#allocation7 + $0x508] sm:$0xff]  ;;  %v551_v17 = vld [vmem:[#allocation7 + $0x580] sm:$0xff] }
 0x11b   : > { %2114 = vmatprep.subr.mxu0 %v534_v19  ;;  %2149 = vmatprep.subr.mxu1 %v566_v20  ;;  %v503_v18 = vld [vmem:[#allocation7 + $0x400] sm:$0xff]  ;;  %v372_v19 = vld [vmem:[%s2607_s14 + $0x48] sm:$0xff] }
 0x11c   : > { %1466 = vmatmul.mubr.f32.vlgmr.msra.gmra.mxu1 %v369_v21  ;;  %2115 = vmatpush3.msra.mxu0 %v518_v22  ;;  %v535_v20 = vld [vmem:[#allocation7 + $0x500] sm:$0xff]  ;;  %v374_v21 = vld [vmem:[%s2607_s14 + $0x58] sm:$0xff] }
 0x11d   : > { %2150 = vmatpush3.msra.mxu1 %v550_v23  ;;  %2116 = vmatprep.subr.mxu0 %v533_v24  ;;  %v371_v22 = vld [vmem:[%s2607_s14 + $0x40] sm:$0xff]  ;;  %v373_v23 = vld [vmem:[%s2607_s14 + $0x50] sm:$0xff] }
 0x11e   : > { %2151 = vmatprep.subr.mxu1 %v565_v25  ;;  %2117 = vmatpush3.msra.mxu0 %v517_v26 }
 0x11f   : > { %2152 = vmatpush3.msra.mxu1 %v549_v27  ;;  %2118 = vmatprep.subr.mxu0 %v532_v28 }
 0x120   : > { %2153 = vmatprep.subr.mxu1 %v564_v29  ;;  %2119 = vmatpush3.msra.mxu0 %v516_v30 }
 0x121   : > { %2154 = vmatpush3.msra.mxu1 %v548_v31  ;;  %2120 = vmatprep.subr.mxu0 %v531_v32 }
 0x122   : > { %2155 = vmatprep.subr.mxu1 %v563_v33  ;;  %2121 = vmatpush3.msra.mxu0 %v515_v34 }
 0x123   : > { %2156 = vmatpush3.msra.mxu1 %v547_v35  ;;  %2122 = vmatprep.subr.mxu0 %v530_v36 }
 0x124   : > { %2157 = vmatprep.subr.mxu1 %v562_v37  ;;  %2123 = vmatpush3.msra.mxu0 %v514_v38 }
 0x125   : > { %2158 = vmatpush3.msra.mxu1 %v546_v39  ;;  %2124 = vmatprep.subr.mxu0 %v529_v40 }
 0x126   : > { %2159 = vmatprep.subr.mxu1 %v561_v41  ;;  %2125 = vmatpush3.msra.mxu0 %v513_v42 }
 0x127   : > { %2160 = vmatpush3.msra.mxu1 %v545_v43  ;;  %2126 = vmatprep.subr.mxu0 %v528_v44 }
 0x128   : > { %2161 = vmatprep.subr.mxu1 %v560_v45  ;;  %2127 = vmatpush3.msra.mxu0 %v512_v46 }
 0x129   : > { %2162 = vmatpush3.msra.mxu1 %v544_v47  ;;  %2128 = vmatprep.subr.mxu0 %v527_v48 }
 0x12a   : > { %2163 = vmatprep.subr.mxu1 %v559_v49  ;;  %2129 = vmatpush3.msra.mxu0 %v511_v50 }
 0x12b   : > { %2164 = vmatpush3.msra.mxu1 %v543_v51  ;;  %2130 = vmatprep.subr.mxu0 %v526_v52 }
 0x12c   : > { %2165 = vmatprep.subr.mxu1 %v558_v53  ;;  %2131 = vmatpush3.msra.mxu0 %v510_v54 }
 0x12d   : > { %2166 = vmatpush3.msra.mxu1 %v542_v55  ;;  %2132 = vmatprep.subr.mxu0 %v525_v56 }
 0x12e   : > { %2167 = vmatprep.subr.mxu1 %v557_v57  ;;  %2133 = vmatpush3.msra.mxu0 %v509_v58 }
 0x12f   : > { %2168 = vmatpush3.msra.mxu1 %v541_v59  ;;  %2134 = vmatprep.subr.mxu0 %v524_v60 }
 0x130   : > { %2169 = vmatprep.subr.mxu1 %v556_v61  ;;  %2135 = vmatpush3.msra.mxu0 %v508_v62 }
 0x131   : > { %2170 = vmatpush3.msra.mxu1 %v540_v63  ;;  %2136 = vmatprep.subr.mxu0 %v523_v0 }
 0x132   : > { %2171 = vmatprep.subr.mxu1 %v555_v1  ;;  %2137 = vmatpush3.msra.mxu0 %v507_v2 }
 0x133   : > { %2172 = vmatpush3.msra.mxu1 %v539_v3  ;;  %2138 = vmatprep.subr.mxu0 %v522_v4 }
 0x134   : > { %2173 = vmatprep.subr.mxu1 %v554_v5  ;;  %2139 = vmatpush3.msra.mxu0 %v506_v6  ;;  %v1759_v6 = vld [vmem:[%s2680_s4] ss:$0 sm:$0xff] }
 0x135   : > { %2174 = vmatpush3.msra.mxu1 %v538_v7  ;;  %2140 = vmatprep.subr.mxu0 %v521_v8 }
 0x136   : > { %2175 = vmatprep.subr.mxu1 %v553_v9  ;;  %2141 = vmatpush3.msra.mxu0 %v505_v10  ;;  %v1760_v9 = vld [vmem:[%s2681_s5] ss:$0 sm:$0xff] }
 0x137   : > { %2176 = vmatpush3.msra.mxu1 %v537_v11  ;;  %2142 = vmatprep.subr.mxu0 %v520_v12  ;;  %v1631_v12 = vstv %s1630_s17 }
 0x138   : > { %2177 = vmatprep.subr.mxu1 %v552_v13  ;;  %2143 = vmatpush3.msra.mxu0 %v504_v14 }
 0x139   : > { %2178 = vmatpush3.msra.mxu1 %v536_v15  ;;  %2144 = vmatprep.subr.mxu0 %v519_v16 }
 0x13a   : > { %2179 = vmatprep.subr.mxu1 %v551_v17  ;;  %2145 = vmatpush3.msra.mxu0 %v503_v18 }
 0x13b   : > { %1535 = vmatprep.mubr.f32.mxu0 %v372_v19  ;;  %2180 = vmatpush3.msra.mxu1 %v535_v20 }
 0x13c   : > { %1605 = vmatprep.mubr.f32.mxu1 %v374_v21  ;;  %1536 = vmatmul.mubr.f32.vlgmr.msra.gmra.mxu0 %v371_v22 }
 0x13d   : > { %1606 = vmatmul.mubr.f32.vlgmr.msra.gmra.mxu1 %v373_v23 }
 0x152   : > { %v1796_v24 = vpop.f32.mrf.mxu0 }
 0x153   : > { %v1831_v25 = vpop.f32.mrf.mxu1 }
 0x154   : > { %v1797_v26 = vpop.f32.mrf.mxu0 }
 0x155   : > { %v1832_v28 = vpop.f32.mrf.mxu1  ;;  %v1798_v31 = vadd.f32 %v1797_v26, %v1796_v24 }
 0x156   : > { %v1833_v32 = vadd.f32 %v1832_v28, %v1831_v25 }
 0x158   : > { %v908_v36 = vadd.f32 %v1833_v32, %v1798_v31 }
 0x174   : > { %v1866_v27 = vpop.f32.mrf.mxu0 }
 0x176   : > { %v1901_v29 = vpop.f32.mrf.mxu1  ;;  %v1867_v30 = vpop.f32.mrf.mxu0 }
 0x177   : > { %v1868_v34 = vadd.f32 %v1867_v30, %v1866_v27 }
 0x178   : > { %v1902_v35 = vpop.f32.mrf.mxu1 }
 0x179   : > { %v978_v39 = vadd.f32 %v1868_v34, %v908_v36  ;;  %v1903_v40 = vadd.f32 %v1902_v35, %v1901_v29 }
 0x17b   : > { %v1048_v44 = vadd.f32 %v1903_v40, %v978_v39 }
 0x196   : > { %v1936_v33 = vpop.f32.mrf.mxu0 }
 0x198   : > { %v1971_v37 = vpop.f32.mrf.mxu1  ;;  %v1937_v38 = vpop.f32.mrf.mxu0 }
 0x199   : > { %v1938_v42 = vadd.f32 %v1937_v38, %v1936_v33 }
 0x19a   : > { %v1972_v43 = vpop.f32.mrf.mxu1 }
 0x19b   : > { %v1118_v47 = vadd.f32 %v1938_v42, %v1048_v44  ;;  %v1973_v48 = vadd.f32 %v1972_v43, %v1971_v37 }
 0x19d   : > { %v1188_v52 = vadd.f32 %v1973_v48, %v1118_v47 }
 0x1b8   : > { %v2006_v41 = vpop.f32.mrf.mxu0 }
 0x1ba   : > { %v2041_v45 = vpop.f32.mrf.mxu1  ;;  %v2007_v46 = vpop.f32.mrf.mxu0 }
 0x1bb   : > { %v2008_v50 = vadd.f32 %v2007_v46, %v2006_v41 }
 0x1bc   : > { %v2042_v51 = vpop.f32.mrf.mxu1 }
 0x1bd   : > { %v1258_v55 = vadd.f32 %v2008_v50, %v1188_v52  ;;  %v2043_v56 = vadd.f32 %v2042_v51, %v2041_v45 }
 0x1bf   : > { %v1328_v59 = vadd.f32 %v2043_v56, %v1258_v55 }
 0x1da   : > { %v2076_v49 = vpop.f32.mrf.mxu0 }
 0x1dc   : > { %v2111_v53 = vpop.f32.mrf.mxu1  ;;  %v2077_v54 = vpop.f32.mrf.mxu0 }
 0x1dd   : > { %v2078_v57 = vadd.f32 %v2077_v54, %v2076_v49 }
 0x1de   : > { %v2112_v58 = vpop.f32.mrf.mxu1 }
 0x1df   : > { %v1398_v60 = vadd.f32 %v2078_v57, %v1328_v59  ;;  %v2113_v61 = vadd.f32 %v2112_v58, %v2111_v53 }
 0x1e1   : > { %v1468_v2 = vadd.f32 %v2113_v61, %v1398_v60 }
 0x1fc   : > { %v2146_v62 = vpop.f32.mrf.mxu0 }
 0x1fd   : > { %v2181_v63 = vpop.f32.mrf.mxu1 }
 0x1fe   : > { %v2147_v0 = vpop.f32.mrf.mxu0 }
 0x1ff   : > { %v2182_v1 = vpop.f32.mrf.mxu1  ;;  %v2148_v3 = vadd.f32 %v2147_v0, %v2146_v62 }
 0x200   : > { %v2183_v5 = vadd.f32 %v2182_v1, %v2181_v63 }
 0x201   : > { %v1538_v4 = vadd.f32 %v2148_v3, %v1468_v2 }
 0x203   : > { %v1608_v7 = vadd.f32 %v2183_v5, %v1538_v4 }
 0x205   : > { %v1618_v8 = vadd.f32 %v1759_v6, %v1608_v7 }
 0x207   : > { %v1619_v10 = vmax.f32 %v1618_v8, 0.0 }
 0x209   : > { %v1627_v11 = vmul.f32 %v1760_v9, %v1619_v10 }
 0x20b   : > { %1628 = vadd.xlane.f32.xlu0 %v1627_v11 }
 0x294   : > { %v1629_v13 = vpop.xlane.xlu0 %1628 }
 0x295   : > { %v1632_v14 = vadd.f32 %v1631_v12, %v1629_v13 }
 0x297   : > { %v1761_v15 = vmul.f32 -1.442695, %v1632_v14 }
 0x299   : > { %2256 = vpow2.f32 %v1761_v15 }
 0x2a6   : > { %v2257_v16 = vpop.eup %2256 }
 0x2a7   : > { %v1636_v17 = vadd.f32 1.0, %v2257_v16 }
 0x2a9   : > { %2258 = vrcp.f32 %v1636_v17 }
 0x2b6   : > { %v2259_v18 = vpop.eup %2258 }
 0x2b7   : > { %1640 = vst.msk [vmem:[%s362_s29] sm:$0xff] %vm1639_vm0, %v2259_v18 }
 0x2b8 PF: > { %s2697_s9 = smov %s2538_s26  ;;  %p22_p13 = scmp.ge.s32.totalorder %s2527_s22, 5  }
 0x2b9   : > { %s2698_s26 = smov %s2406_s27  ;;  %s2699_s27 = smov %s2410_s28 }
 0x2ba   : > { %s2700_s28 = smov %s2697_s9  ;;  %s2701_s29 = smov %s2527_s22 }
 0x2bb   :  { %24 = sbr.rel (!%p22_p13) target bundleno = 8 (0x8), region = 109 }
 0x2c0   :  { %1660 = vsyncpa [#allocation4], 1 }
 0x2c1   :  { %1662 = vsyncpa [#allocation4 + $0x1], 1 }
 0x2c2   :  { %1663 = vsyncpa [#allocation6], 1 }
 0x2c3   :  { %1665 = vsyncpa [#allocation6 + $0x1], 1 }
 0x2c4   :  { %1666 = vsyncpa [#allocation9], 1 }

</bundles_post_ra>
